<compile_context>
chip_gen: v5e
topology: v5e:2x2
jax: 0.10.0
libtpu: 0.0.40
codegen_flags: <defaults>
</compile_context>

<pallas_src>
import math

import jax
import jax.numpy as jnp
from jax.experimental import pallas as pl
from jax.experimental.pallas import tpu as pltpu


_TINY_BYTES = 512 * 1024  # below this, plain XLA beats pallas_call overhead


def _cdiv(a, b):
    return -(-a // b)


def _round_up(a, b):
    return _cdiv(a, b) * b


def _sublane_multiple(dtype) -> int:
    """Minimum row-tile multiple so (tile_n, ...) blocks are layout-legal."""
    itemsize = jnp.dtype(dtype).itemsize
    return max(8, 32 // itemsize)  # f32 -> 8, bf16 -> 16, int8/fp8 -> 32


def _vmem_budget_bytes() -> int:
    """Generation-aware scoped-VMEM budget (headroom below physical VMEM)."""
    try:
        cap = int(pltpu.get_tpu_info().vmem_capacity_bytes)
    except Exception:
        cap = 64 * 1024 * 1024  # conservative: v7x has 64 MiB per TensorCore
    return max(16 << 20, min(int(cap * 0.6), 64 << 20))


def _choose_fold(N, F, itemsize, max_k=128, max_row_bytes=64 * 1024) -> int:
    """Smallest k with N % k == 0 and (k*F) % 128 == 0 (lane-dense rows)."""
    if N <= 1:
        return 1
    for k in range(1, max_k + 1):
        if k * F * itemsize > max_row_bytes:
            break
        if N % k or (k * F) % 128:
            continue
        return k
    return 1


def _scale_shift_kernel(x_ref, ms_ref, o_ref):
    # x_ref : (tile_rows, tile_f) block of the input (x.dtype)
    # ms_ref: (2, tile_f) f32;  row 0 = stddev, row 1 = mean
    # o_ref : (tile_rows, tile_f) output block (x.dtype)
    x = x_ref[...].astype(jnp.float32)
    stddev = ms_ref[0:1, :]  # (1, tile_f) -> broadcasts over rows
    mean = ms_ref[1:2, :]
    o_ref[...] = (x * stddev + mean).astype(o_ref.dtype)


def scale_shift(x, mean, stddev):
    """y = x * stddev + mean, broadcasting scalar or per-feature params.

    x: (..., F); mean/stddev: scalar or (F,)-shaped (matches the PyTorch
    module's buffer broadcasting).
    """
    orig_shape = x.shape
    orig_dtype = x.dtype
    F = orig_shape[-1] if len(orig_shape) >= 1 else 1
    N = math.prod(orig_shape[:-1]) if len(orig_shape) > 1 else 1
    itemsize = jnp.dtype(orig_dtype).itemsize
    total_bytes = N * F * itemsize

    mean_a = jnp.asarray(mean, jnp.float32)
    stddev_a = jnp.asarray(stddev, jnp.float32)

    # General broadcasting shapes (rare for this module): plain XLA fallback.
    if mean_a.size not in (1, F) or stddev_a.size not in (1, F):
        return (x.astype(jnp.float32) * stddev_a + mean_a).astype(orig_dtype)

    mean_f = jnp.broadcast_to(mean_a.reshape(-1), (F,))
    stddev_f = jnp.broadcast_to(stddev_a.reshape(-1), (F,))

    # Tiny problems: fixed pallas_call overhead dominates -> fused XLA op.
    if total_bytes <= _TINY_BYTES:
        return (x.astype(jnp.float32) * stddev_f + mean_f).astype(orig_dtype)

    x2 = x.reshape(N, F)

    # Optional free row-fold to make rows lane-dense (wide unmasked stores).
    k = _choose_fold(N, F, itemsize)
    if k > 1:
        N_k, F_k = N // k, F * k
        x2 = x2.reshape(N_k, F_k)
        mean_k = jnp.tile(mean_f, k)
        stddev_k = jnp.tile(stddev_f, k)
    else:
        N_k, F_k = N, F
        mean_k, stddev_k = mean_f, stddev_f

    ms = jnp.stack([stddev_k, mean_k], axis=0)  # (2, F_k) f32, grid-invariant

    sub = _sublane_multiple(orig_dtype)
    budget = _vmem_budget_bytes()
    target_tile_bytes = min(2 << 20, budget // 8)  # ~2 MiB per input tile

    if sub * F_k * itemsize > target_tile_bytes:
        # Very wide feature dim: 2-D grid (rows x feature blocks), so even a
        # minimum-height slab never overflows VMEM.
        tile_rows = min(_round_up(N_k, sub), max(sub, (256 // sub) * sub))
        tile_f = max(128, (target_tile_bytes // (tile_rows * itemsize)) // 128 * 128)
        tile_f = min(tile_f, _round_up(F_k, 128))
        grid = (_cdiv(N_k, tile_rows), _cdiv(F_k, tile_f))
        in_specs = [
            pl.BlockSpec((tile_rows, tile_f), lambda i, j: (i, j)),
            pl.BlockSpec((2, tile_f), lambda i, j: (0, j)),
        ]
        out_spec = pl.BlockSpec((tile_rows, tile_f), lambda i, j: (i, j))
        dims = ("parallel", "parallel")
        tile_f_live = tile_f
    else:
        # Common path: 1-D grid over rows; block last dim == full F (legal for
        # any F, no padding / slicing passes for ragged feature dims).
        row_bytes = F_k * itemsize
        tile_rows = max(sub, (target_tile_bytes // row_bytes) // sub * sub)
        tile_rows = min(tile_rows, _round_up(N_k, sub))
        # Large problems: guarantee enough steps for DMA pipelining and a
        # balanced split across v7x's two TensorCores.
        if total_bytes >= (16 << 20):
            max_tile = max(sub, _round_up(_cdiv(N_k, 8), sub))
            tile_rows = min(tile_rows, max_tile)
        grid = (_cdiv(N_k, tile_rows),)
        in_specs = [
            pl.BlockSpec((tile_rows, F_k), lambda i: (i, 0)),
            pl.BlockSpec((2, F_k), lambda i: (0, 0)),
        ]
        out_spec = pl.BlockSpec((tile_rows, F_k), lambda i: (i, 0))
        dims = ("parallel",)
        tile_f_live = F_k

    # Explicit scoped-VMEM limit: double-buffered in/out tiles + params, with
    # headroom, capped by the generation-aware budget.
    live_bytes = 4 * tile_rows * tile_f_live * itemsize + 4 * 2 * tile_f_live * 4
    vmem_limit = int(min(max(2 * live_bytes, 4 << 20), budget))

    out = pl.pallas_call(
        _scale_shift_kernel,
        out_shape=jax.ShapeDtypeStruct((N_k, F_k), orig_dtype),
        grid_spec=pltpu.PrefetchScalarGridSpec(
            num_scalar_prefetch=0,
            grid=grid,
            in_specs=in_specs,
            out_specs=out_spec,
        ),
        compiler_params=pltpu.CompilerParams(
            dimension_semantics=dims,
            vmem_limit_bytes=vmem_limit,
        ),
    )(x2, ms)

    return out.reshape(orig_shape)


class ScaleShift:
    """JAX/Pallas port of the PyTorch ScaleShift module (y = x * sigma + mu)."""

    def __init__(self, mean, stddev):
        self.mean = jnp.asarray(mean)
        self.stddev = jnp.asarray(stddev)

    def __call__(self, x):
        return scale_shift(x, self.mean, self.stddev)


def _ref(x, mean, stddev):
    return (x.astype(jnp.float32) * jnp.asarray(stddev, jnp.float32)
            + jnp.asarray(mean, jnp.float32)).astype(x.dtype)


if __name__ == "__main__":
    key = jax.random.PRNGKey(0)
    keys = jax.random.split(key, 8)

    # 1) Small shape consistent with the module (goes through the fused-XLA
    #    tiny path): 16 samples x 128 features.
    x1 = jax.random.normal(keys[0], (16, 128), dtype=jnp.float32)
    m1 = jax.random.normal(keys[1], (128,), dtype=jnp.float32)
    s1 = jnp.abs(jax.random.normal(keys[2], (128,), dtype=jnp.float32)) + 0.5
    y1 = ScaleShift(m1, s1)(x1)
    jax.block_until_ready(y1)
    assert jnp.allclose(y1, _ref(x1, m1, s1), atol=1e-5, rtol=1e-5)

    # 2) Moderate shape -> Pallas 1-D grid path (F already lane-dense).
    x2 = jax.random.normal(keys[3], (2048, 128), dtype=jnp.float32)
    y2 = scale_shift(x2, m1, s1)
    jax.block_until_ready(y2)
    assert jnp.allclose(y2, _ref(x2, m1, s1), atol=1e-5, rtol=1e-5)

    # 3) Ragged F with foldable N -> Pallas path with row-fold (200*16 = 3200).
    m3 = jax.random.normal(keys[4], (200,), dtype=jnp.float32)
    s3 = jnp.abs(jax.random.normal(keys[5], (200,), dtype=jnp.float32)) + 0.5
    x3 = jax.random.normal(keys[6], (768, 200), dtype=jnp.float32)
    y3 = scale_shift(x3, m3, s3)
    jax.block_until_ready(y3)
    assert jnp.allclose(y3, _ref(x3, m3, s3), atol=1e-5, rtol=1e-5)

    # 4) Ragged F, non-foldable N -> Pallas path with full-F block (masked
    #    lane-edge stores, no padding pass).
    x4 = jax.random.normal(keys[7], (769, 200), dtype=jnp.float32)
    y4 = scale_shift(x4, m3, s3)
    jax.block_until_ready(y4)
    assert jnp.allclose(y4, _ref(x4, m3, s3), atol=1e-5, rtol=1e-5)

    # 5) Very wide feature dim -> Pallas 2-D grid (F tiled in 128 multiples).
    xw = jax.random.normal(keys[0], (16, 70000), dtype=jnp.float32)
    mw = jax.random.normal(keys[1], (70000,), dtype=jnp.float32)
    sw = jnp.abs(jax.random.normal(keys[2], (70000,), dtype=jnp.float32)) + 0.5
    yw = scale_shift(xw, mw, sw)
    jax.block_until_ready(yw)
    assert jnp.allclose(yw, _ref(xw, mw, sw), atol=1e-5, rtol=1e-5)

    # 6) Higher-rank input with scalar mean/stddev (module-style broadcasting).
    x6 = jax.random.normal(keys[3], (2, 4, 32), dtype=jnp.float32)
    y6 = scale_shift(x6, 1.5, 0.25)
    jax.block_until_ready(y6)
    assert jnp.allclose(y6, x6 * 0.25 + 1.5, atol=1e-5, rtol=1e-5)

    print("KERNEL_OK")
</pallas_src>

<mosaic_0001>
module attributes {stable_mosaic.version = 11 : i64} {
  func.func @_scale_shift_kernel(%arg0: i32, %arg1: memref<2048x128xf32, #tpu.memory_space<vmem>>, %arg2: memref<2x128xf32, #tpu.memory_space<vmem>>, %arg3: memref<2048x128xf32, #tpu.memory_space<vmem>>) attributes {dimension_semantics = [#tpu.dimension_semantics<parallel>], iteration_bounds = array<i64: 1>, scalar_prefetch = 0 : i64, scratch_operands = 0 : i64, tpu.core_type = #tpu.core_type<tc>, window_params = [{transform_indices = @transform_0, window_bounds = array<i64: 2048, 128>}, {pipeline_mode = #tpu.pipeline_mode<synchronous>, transform_indices = @transform_1, window_bounds = array<i64: 2, 128>}, {transform_indices = @transform_2, window_bounds = array<i64: 2048, 128>}]} {
    %c0 = arith.constant 0 : index
    %c0_0 = arith.constant 0 : index
    %0 = vector.load %arg1[%c0, %c0_0] : memref<2048x128xf32, #tpu.memory_space<vmem>>, vector<2048x128xf32>
    %c0_1 = arith.constant 0 : index
    %c0_2 = arith.constant 0 : index
    %1 = vector.load %arg2[%c0_1, %c0_2] : memref<2x128xf32, #tpu.memory_space<vmem>>, vector<1x128xf32>
    %c1 = arith.constant 1 : index
    %c0_3 = arith.constant 0 : index
    %2 = vector.load %arg2[%c1, %c0_3] : memref<2x128xf32, #tpu.memory_space<vmem>>, vector<1x128xf32>
    %3 = vector.broadcast %1 : vector<1x128xf32> to vector<2048x128xf32>
    %4 = arith.mulf %0, %3 : vector<2048x128xf32>
    %5 = vector.broadcast %2 : vector<1x128xf32> to vector<2048x128xf32>
    %6 = arith.addf %4, %5 : vector<2048x128xf32>
    %c0_4 = arith.constant 0 : index
    %c0_5 = arith.constant 0 : index
    %7 = vector.load %arg3[%c0_4, %c0_5] : memref<2048x128xf32, #tpu.memory_space<vmem>>, vector<2048x128xf32>
    tpu.vector_store %arg3[%c0_4, %c0_5], %6 {strides = array<i32>} : memref<2048x128xf32, #tpu.memory_space<vmem>>, vector<2048x128xf32>,
    return
  }
  func.func @transform_0(%arg0: i32) -> (i32, i32) {
    %c0_i32 = arith.constant 0 : i32
    %c0_i32_0 = arith.constant 0 : i32
    return %arg0, %c0_i32 : i32, i32
  }
  func.func @transform_1(%arg0: i32) -> (i32, i32) {
    %c0_i32 = arith.constant 0 : i32
    %c0_i32_0 = arith.constant 0 : i32
    %c0_i32_1 = arith.constant 0 : i32
    return %c0_i32, %c0_i32_0 : i32, i32
  }
  func.func @transform_2(%arg0: i32) -> (i32, i32) {
    %c0_i32 = arith.constant 0 : i32
    %c0_i32_0 = arith.constant 0 : i32
    return %arg0, %c0_i32 : i32, i32
  }
}

</mosaic_0001>

<bundles_post_ra>
// kernel: tpu_custom_call.1
= control target key start
LH: loop header
LB: loop body
LE: loop exit
PB: predicated region body
PF: predicated region fallthrough
CT: control target
= control target key end

     0   :  { %7 = vsyncpa [#allocation3], 0  ;;  %s1732_s0 = inlined_call_operand.hbm [shape: f32[2048,128], index: 0, kind: input, shape index: {}]   ;;  %s1733_s1 = inlined_call_operand.hbm [shape: f32[2,128], index: 1, kind: input, shape index: {}]   ;;  %s1734_s2 = inlined_call_operand.hbm [shape: f32[2048,128], index: 2, kind: output, shape index: {}]  }
   0x1   :  { %8 = vsyncpa [#allocation6], 0 }
   0x2   :  { %9 = vsyncpa [#allocation4], 0  ;;  %s14_s11 = sshll.u32 %s1732_s0, 4  ;;  %s1177_s12 = smov [#allocation2]   ;;  %s15_s11 = int_to_ptr.hbm [resolvable:$true] %s14_s11 }
   0x3   :  { %s16_s13 = sshll.u32 %s1177_s12, 4  ;;  %s28_s16 = sshll.u32 %s1733_s1, 4  ;;  %s17_s13 = int_to_ptr.vmem [resolvable:$true] %s16_s13  ;;  %s29_s16 = int_to_ptr.hbm [resolvable:$true] %s28_s16 }
   0x4   :  { %s1178_s17 = smov 128   ;;  %s1179_s18 = smov 8  }
   0x5   :  { %22 = dma.hbm_to_vmem [thread:$0]  %s15_s11, 32768, %s17_s13, [#allocation3], %s1178_s17, %s1178_s17, %s1179_s18  }
   0x6   :  { %s1180_s19 = smov [#allocation5]  }
   0x7   :  { %s30_s20 = sshll.u32 %s1180_s19, 4  ;;  %s31_s20 = int_to_ptr.vmem [resolvable:$true] %s30_s20 }
   0x8   :  { %33 = dma.hbm_to_vmem [thread:$0]  %s29_s16, 32, %s31_s20, [#allocation6]  }
   0x9   :  { %1171 = dma.done.wait [#allocation3], 32768  }
   0xa   :  { %1172 = vsyncadd [#allocation3], 4294934528 }
   0xb   :  { %1173 = dma.done.wait [#allocation6], 32  }
   0xc   :  { %1174 = vsyncadd [#allocation6], 4294967264  ;;  %v42_v0 = vld [vmem:[#allocation2] sm:$0xff]  ;;  %v43_v3 = vld [vmem:[#allocation2 + $0x8] sm:$0xff]  ;;  %s1181_s0 = smov [#allocation7]   ;;  %s1076_s23 = sshll.u32 %s1734_s2, 4  ;;  %s1077_s23 = int_to_ptr.hbm [resolvable:$true] %s1076_s23 }
   0xd   :  { %v1206_v1 = vld [vmem:[#allocation5] ss:$0 sm:$0xff]  ;;  %v1208_v2 = vld [vmem:[#allocation5 + $0x1] ss:$0 sm:$0xff]  ;;  %v44_v4 = vld [vmem:[#allocation2 + $0x10] sm:$0xff]  ;;  %s1074_s1 = sshll.u32 %s1181_s0, 4  ;;  %s1075_s1 = int_to_ptr.vmem [resolvable:$true] %s1074_s1 }
   0xe   :  { %v45_v5 = vld [vmem:[#allocation2 + $0x18] sm:$0xff]  ;;  %v46_v6 = vld [vmem:[#allocation2 + $0x20] sm:$0xff]  ;;  %v301_v7 = vmul.f32 %v1206_v1, %v42_v0  ;;  %v302_v8 = vmul.f32 %v1206_v1, %v43_v3  ;;  %v303_v9 = vmul.f32 %v1206_v1, %v44_v4  ;;  %v47_v11 = vld [vmem:[#allocation2 + $0x28] sm:$0xff] }
   0xf   :  { %v304_v10 = vmul.f32 %v1206_v1, %v45_v5  ;;  %v48_v12 = vld [vmem:[#allocation2 + $0x30] sm:$0xff]  ;;  %v49_v13 = vld [vmem:[#allocation2 + $0x38] sm:$0xff]  ;;  %v305_v14 = vmul.f32 %v1206_v1, %v46_v6  ;;  %v306_v15 = vmul.f32 %v1206_v1, %v47_v11  ;;  %v50_v16 = vld [vmem:[#allocation2 + $0x40] sm:$0xff] }
  0x10   :  { %v558_v17 = vadd.f32 %v1208_v2, %v301_v7  ;;  %v559_v18 = vadd.f32 %v1208_v2, %v302_v8  ;;  %v560_v19 = vadd.f32 %v1208_v2, %v303_v9  ;;  %v307_v20 = vmul.f32 %v1206_v1, %v48_v12  ;;  %v51_v21 = vld [vmem:[#allocation2 + $0x48] sm:$0xff]  ;;  %v52_v24 = vld [vmem:[#allocation2 + $0x50] sm:$0xff]  ;;  %v53_v27 = vld [vmem:[#allocation2 + $0x58] sm:$0xff] }
  0x11   :  { %v561_v22 = vadd.f32 %v1208_v2, %v304_v10  ;;  %v308_v23 = vmul.f32 %v1206_v1, %v49_v13  ;;  %v562_v25 = vadd.f32 %v1208_v2, %v305_v14  ;;  %v309_v26 = vmul.f32 %v1206_v1, %v50_v16  ;;  %v54_v30 = vld [vmem:[#allocation2 + $0x60] sm:$0xff]  ;;  %v55_v33 = vld [vmem:[#allocation2 + $0x68] sm:$0xff]  ;;  %v56_v36 = vld [vmem:[#allocation2 + $0x70] sm:$0xff] }
  0x12   :  { %814 = vst [vmem:[#allocation7] sm:$0xff] %v558_v17  ;;  %v563_v28 = vadd.f32 %v1208_v2, %v306_v15  ;;  %v310_v29 = vmul.f32 %v1206_v1, %v51_v21  ;;  %v564_v31 = vadd.f32 %v1208_v2, %v307_v20  ;;  %v311_v32 = vmul.f32 %v1206_v1, %v52_v24  ;;  %v57_v39 = vld [vmem:[#allocation2 + $0x78] sm:$0xff]  ;;  %v58_v42 = vld [vmem:[#allocation2 + $0x80] sm:$0xff]  ;;  %v59_v45 = vld [vmem:[#allocation2 + $0x88] sm:$0xff] }
  0x13   :  { %815 = vst [vmem:[#allocation7 + $0x8] sm:$0xff] %v559_v18  ;;  %v565_v34 = vadd.f32 %v1208_v2, %v308_v23  ;;  %v312_v35 = vmul.f32 %v1206_v1, %v53_v27  ;;  %v566_v37 = vadd.f32 %v1208_v2, %v309_v26  ;;  %v313_v38 = vmul.f32 %v1206_v1, %v54_v30  ;;  %v60_v48 = vld [vmem:[#allocation2 + $0x90] sm:$0xff]  ;;  %v61_v51 = vld [vmem:[#allocation2 + $0x98] sm:$0xff]  ;;  %v62_v54 = vld [vmem:[#allocation2 + $0xa0] sm:$0xff] }
  0x14   :  { %816 = vst [vmem:[#allocation7 + $0x10] sm:$0xff] %v560_v19  ;;  %v567_v40 = vadd.f32 %v1208_v2, %v310_v29  ;;  %v314_v41 = vmul.f32 %v1206_v1, %v55_v33  ;;  %v568_v43 = vadd.f32 %v1208_v2, %v311_v32  ;;  %v315_v44 = vmul.f32 %v1206_v1, %v56_v36  ;;  %v63_v57 = vld [vmem:[#allocation2 + $0xa8] sm:$0xff]  ;;  %v64_v60 = vld [vmem:[#allocation2 + $0xb0] sm:$0xff]  ;;  %v65_v63 = vld [vmem:[#allocation2 + $0xb8] sm:$0xff] }
  0x15   :  { %817 = vst [vmem:[#allocation7 + $0x18] sm:$0xff] %v561_v22  ;;  %v569_v46 = vadd.f32 %v1208_v2, %v312_v35  ;;  %v316_v47 = vmul.f32 %v1206_v1, %v57_v39  ;;  %v570_v49 = vadd.f32 %v1208_v2, %v313_v38  ;;  %v317_v50 = vmul.f32 %v1206_v1, %v58_v42  ;;  %v66_v4 = vld [vmem:[#allocation2 + $0xc0] sm:$0xff]  ;;  %v67_v7 = vld [vmem:[#allocation2 + $0xc8] sm:$0xff]  ;;  %v68_v10 = vld [vmem:[#allocation2 + $0xd0] sm:$0xff] }
  0x16   :  { %818 = vst [vmem:[#allocation7 + $0x20] sm:$0xff] %v562_v25  ;;  %v571_v52 = vadd.f32 %v1208_v2, %v314_v41  ;;  %v318_v53 = vmul.f32 %v1206_v1, %v59_v45  ;;  %v572_v55 = vadd.f32 %v1208_v2, %v315_v44  ;;  %v319_v56 = vmul.f32 %v1206_v1, %v60_v48  ;;  %v69_v13 = vld [vmem:[#allocation2 + $0xd8] sm:$0xff]  ;;  %v70_v16 = vld [vmem:[#allocation2 + $0xe0] sm:$0xff]  ;;  %v71_v19 = vld [vmem:[#allocation2 + $0xe8] sm:$0xff] }
  0x17   :  { %819 = vst [vmem:[#allocation7 + $0x28] sm:$0xff] %v563_v28  ;;  %v573_v58 = vadd.f32 %v1208_v2, %v316_v47  ;;  %v320_v59 = vmul.f32 %v1206_v1, %v61_v51  ;;  %v574_v61 = vadd.f32 %v1208_v2, %v317_v50  ;;  %v321_v62 = vmul.f32 %v1206_v1, %v62_v54  ;;  %v72_v22 = vld [vmem:[#allocation2 + $0xf0] sm:$0xff]  ;;  %v73_v25 = vld [vmem:[#allocation2 + $0xf8] sm:$0xff]  ;;  %v74_v28 = vld [vmem:[#allocation2 + $0x100] sm:$0xff] }
  0x18   :  { %820 = vst [vmem:[#allocation7 + $0x30] sm:$0xff] %v564_v31  ;;  %v575_v0 = vadd.f32 %v1208_v2, %v318_v53  ;;  %v322_v3 = vmul.f32 %v1206_v1, %v63_v57  ;;  %v576_v5 = vadd.f32 %v1208_v2, %v319_v56  ;;  %v323_v6 = vmul.f32 %v1206_v1, %v64_v60  ;;  %v75_v31 = vld [vmem:[#allocation2 + $0x108] sm:$0xff] }
  0x19   :  { %821 = vst [vmem:[#allocation7 + $0x38] sm:$0xff] %v565_v34  ;;  %v577_v8 = vadd.f32 %v1208_v2, %v320_v59  ;;  %v324_v9 = vmul.f32 %v1206_v1, %v65_v63  ;;  %v578_v11 = vadd.f32 %v1208_v2, %v321_v62  ;;  %v325_v12 = vmul.f32 %v1206_v1, %v66_v4  ;;  %v76_v34 = vld [vmem:[#allocation2 + $0x110] sm:$0xff] }
  0x1a   :  { %822 = vst [vmem:[#allocation7 + $0x40] sm:$0xff] %v566_v37  ;;  %v579_v14 = vadd.f32 %v1208_v2, %v322_v3  ;;  %v326_v15 = vmul.f32 %v1206_v1, %v67_v7  ;;  %v580_v17 = vadd.f32 %v1208_v2, %v323_v6  ;;  %v327_v18 = vmul.f32 %v1206_v1, %v68_v10  ;;  %v77_v37 = vld [vmem:[#allocation2 + $0x118] sm:$0xff] }
  0x1b   :  { %823 = vst [vmem:[#allocation7 + $0x48] sm:$0xff] %v567_v40  ;;  %v581_v20 = vadd.f32 %v1208_v2, %v324_v9  ;;  %v328_v21 = vmul.f32 %v1206_v1, %v69_v13  ;;  %v582_v23 = vadd.f32 %v1208_v2, %v325_v12  ;;  %v329_v24 = vmul.f32 %v1206_v1, %v70_v16  ;;  %v78_v40 = vld [vmem:[#allocation2 + $0x120] sm:$0xff] }
  0x1c   :  { %824 = vst [vmem:[#allocation7 + $0x50] sm:$0xff] %v568_v43  ;;  %v583_v26 = vadd.f32 %v1208_v2, %v326_v15  ;;  %v330_v27 = vmul.f32 %v1206_v1, %v71_v19  ;;  %v584_v29 = vadd.f32 %v1208_v2, %v327_v18  ;;  %v331_v30 = vmul.f32 %v1206_v1, %v72_v22  ;;  %v79_v43 = vld [vmem:[#allocation2 + $0x128] sm:$0xff] }
  0x1d   :  { %825 = vst [vmem:[#allocation7 + $0x58] sm:$0xff] %v569_v46  ;;  %v585_v32 = vadd.f32 %v1208_v2, %v328_v21  ;;  %v332_v33 = vmul.f32 %v1206_v1, %v73_v25  ;;  %v586_v35 = vadd.f32 %v1208_v2, %v329_v24  ;;  %v333_v36 = vmul.f32 %v1206_v1, %v74_v28  ;;  %v80_v46 = vld [vmem:[#allocation2 + $0x130] sm:$0xff] }
  0x1e   :  { %826 = vst [vmem:[#allocation7 + $0x60] sm:$0xff] %v570_v49  ;;  %v587_v38 = vadd.f32 %v1208_v2, %v330_v27  ;;  %v334_v39 = vmul.f32 %v1206_v1, %v75_v31  ;;  %v588_v41 = vadd.f32 %v1208_v2, %v331_v30  ;;  %v335_v42 = vmul.f32 %v1206_v1, %v76_v34  ;;  %v81_v49 = vld [vmem:[#allocation2 + $0x138] sm:$0xff] }
  0x1f   :  { %827 = vst [vmem:[#allocation7 + $0x68] sm:$0xff] %v571_v52  ;;  %v589_v44 = vadd.f32 %v1208_v2, %v332_v33  ;;  %v336_v45 = vmul.f32 %v1206_v1, %v77_v37  ;;  %v590_v47 = vadd.f32 %v1208_v2, %v333_v36  ;;  %v337_v48 = vmul.f32 %v1206_v1, %v78_v40  ;;  %v82_v52 = vld [vmem:[#allocation2 + $0x140] sm:$0xff] }
  0x20   :  { %828 = vst [vmem:[#allocation7 + $0x70] sm:$0xff] %v572_v55  ;;  %v591_v50 = vadd.f32 %v1208_v2, %v334_v39  ;;  %v338_v51 = vmul.f32 %v1206_v1, %v79_v43  ;;  %v592_v53 = vadd.f32 %v1208_v2, %v335_v42  ;;  %v339_v54 = vmul.f32 %v1206_v1, %v80_v46  ;;  %v83_v55 = vld [vmem:[#allocation2 + $0x148] sm:$0xff] }
  0x21   :  { %829 = vst [vmem:[#allocation7 + $0x78] sm:$0xff] %v573_v58  ;;  %v593_v56 = vadd.f32 %v1208_v2, %v336_v45  ;;  %v340_v57 = vmul.f32 %v1206_v1, %v81_v49  ;;  %v84_v58 = vld [vmem:[#allocation2 + $0x150] sm:$0xff]  ;;  %v594_v59 = vadd.f32 %v1208_v2, %v337_v48  ;;  %v341_v60 = vmul.f32 %v1206_v1, %v82_v52 }
  0x22   :  { %830 = vst [vmem:[#allocation7 + $0x80] sm:$0xff] %v574_v61  ;;  %v85_v61 = vld [vmem:[#allocation2 + $0x158] sm:$0xff]  ;;  %v595_v62 = vadd.f32 %v1208_v2, %v338_v51  ;;  %v342_v63 = vmul.f32 %v1206_v1, %v83_v55  ;;  %v596_v3 = vadd.f32 %v1208_v2, %v339_v54  ;;  %v343_v4 = vmul.f32 %v1206_v1, %v84_v58 }
  0x23   :  { %831 = vst [vmem:[#allocation7 + $0x88] sm:$0xff] %v575_v0  ;;  %v86_v0 = vld [vmem:[#allocation2 + $0x160] sm:$0xff]  ;;  %v597_v6 = vadd.f32 %v1208_v2, %v340_v57  ;;  %v344_v7 = vmul.f32 %v1206_v1, %v85_v61  ;;  %v598_v9 = vadd.f32 %v1208_v2, %v341_v60 }
  0x24   :  { %832 = vst [vmem:[#allocation7 + $0x90] sm:$0xff] %v576_v5  ;;  %v87_v5 = vld [vmem:[#allocation2 + $0x168] sm:$0xff]  ;;  %v345_v10 = vmul.f32 %v1206_v1, %v86_v0  ;;  %v599_v12 = vadd.f32 %v1208_v2, %v342_v63  ;;  %v600_v15 = vadd.f32 %v1208_v2, %v343_v4 }
  0x25   :  { %833 = vst [vmem:[#allocation7 + $0x98] sm:$0xff] %v577_v8  ;;  %v88_v8 = vld [vmem:[#allocation2 + $0x170] sm:$0xff]  ;;  %v346_v13 = vmul.f32 %v1206_v1, %v87_v5  ;;  %v601_v18 = vadd.f32 %v1208_v2, %v344_v7 }
  0x26   :  { %834 = vst [vmem:[#allocation7 + $0xa0] sm:$0xff] %v578_v11  ;;  %v89_v11 = vld [vmem:[#allocation2 + $0x178] sm:$0xff]  ;;  %v347_v16 = vmul.f32 %v1206_v1, %v88_v8  ;;  %v602_v21 = vadd.f32 %v1208_v2, %v345_v10 }
  0x27   :  { %835 = vst [vmem:[#allocation7 + $0xa8] sm:$0xff] %v579_v14  ;;  %v90_v14 = vld [vmem:[#allocation2 + $0x180] sm:$0xff]  ;;  %v348_v19 = vmul.f32 %v1206_v1, %v89_v11  ;;  %v603_v24 = vadd.f32 %v1208_v2, %v346_v13 }
  0x28   :  { %836 = vst [vmem:[#allocation7 + $0xb0] sm:$0xff] %v580_v17  ;;  %v91_v17 = vld [vmem:[#allocation2 + $0x188] sm:$0xff]  ;;  %v349_v22 = vmul.f32 %v1206_v1, %v90_v14  ;;  %v604_v27 = vadd.f32 %v1208_v2, %v347_v16 }
  0x29   :  { %837 = vst [vmem:[#allocation7 + $0xb8] sm:$0xff] %v581_v20  ;;  %v92_v20 = vld [vmem:[#allocation2 + $0x190] sm:$0xff]  ;;  %v350_v25 = vmul.f32 %v1206_v1, %v91_v17  ;;  %v605_v30 = vadd.f32 %v1208_v2, %v348_v19 }
  0x2a   :  { %838 = vst [vmem:[#allocation7 + $0xc0] sm:$0xff] %v582_v23  ;;  %v93_v23 = vld [vmem:[#allocation2 + $0x198] sm:$0xff]  ;;  %v351_v28 = vmul.f32 %v1206_v1, %v92_v20  ;;  %v606_v33 = vadd.f32 %v1208_v2, %v349_v22 }
  0x2b   :  { %839 = vst [vmem:[#allocation7 + $0xc8] sm:$0xff] %v583_v26  ;;  %v94_v26 = vld [vmem:[#allocation2 + $0x1a0] sm:$0xff]  ;;  %v352_v31 = vmul.f32 %v1206_v1, %v93_v23  ;;  %v607_v36 = vadd.f32 %v1208_v2, %v350_v25 }
  0x2c   :  { %840 = vst [vmem:[#allocation7 + $0xd0] sm:$0xff] %v584_v29  ;;  %v95_v29 = vld [vmem:[#allocation2 + $0x1a8] sm:$0xff]  ;;  %v353_v34 = vmul.f32 %v1206_v1, %v94_v26  ;;  %v608_v39 = vadd.f32 %v1208_v2, %v351_v28 }
  0x2d   :  { %841 = vst [vmem:[#allocation7 + $0xd8] sm:$0xff] %v585_v32  ;;  %v96_v32 = vld [vmem:[#allocation2 + $0x1b0] sm:$0xff]  ;;  %v354_v37 = vmul.f32 %v1206_v1, %v95_v29  ;;  %v609_v42 = vadd.f32 %v1208_v2, %v352_v31 }
  0x2e   :  { %842 = vst [vmem:[#allocation7 + $0xe0] sm:$0xff] %v586_v35  ;;  %v97_v35 = vld [vmem:[#allocation2 + $0x1b8] sm:$0xff]  ;;  %v355_v40 = vmul.f32 %v1206_v1, %v96_v32  ;;  %v610_v45 = vadd.f32 %v1208_v2, %v353_v34 }
  0x2f   :  { %843 = vst [vmem:[#allocation7 + $0xe8] sm:$0xff] %v587_v38  ;;  %v98_v38 = vld [vmem:[#allocation2 + $0x1c0] sm:$0xff]  ;;  %v356_v43 = vmul.f32 %v1206_v1, %v97_v35  ;;  %v611_v48 = vadd.f32 %v1208_v2, %v354_v37 }
  0x30   :  { %844 = vst [vmem:[#allocation7 + $0xf0] sm:$0xff] %v588_v41  ;;  %v99_v41 = vld [vmem:[#allocation2 + $0x1c8] sm:$0xff]  ;;  %v357_v46 = vmul.f32 %v1206_v1, %v98_v38  ;;  %v612_v51 = vadd.f32 %v1208_v2, %v355_v40 }
  0x31   :  { %845 = vst [vmem:[#allocation7 + $0xf8] sm:$0xff] %v589_v44  ;;  %v100_v44 = vld [vmem:[#allocation2 + $0x1d0] sm:$0xff]  ;;  %v358_v49 = vmul.f32 %v1206_v1, %v99_v41  ;;  %v613_v54 = vadd.f32 %v1208_v2, %v356_v43 }
  0x32   :  { %846 = vst [vmem:[#allocation7 + $0x100] sm:$0xff] %v590_v47  ;;  %v101_v47 = vld [vmem:[#allocation2 + $0x1d8] sm:$0xff]  ;;  %v359_v52 = vmul.f32 %v1206_v1, %v100_v44  ;;  %v614_v57 = vadd.f32 %v1208_v2, %v357_v46 }
  0x33   :  { %847 = vst [vmem:[#allocation7 + $0x108] sm:$0xff] %v591_v50  ;;  %v102_v50 = vld [vmem:[#allocation2 + $0x1e0] sm:$0xff]  ;;  %v360_v55 = vmul.f32 %v1206_v1, %v101_v47  ;;  %v615_v60 = vadd.f32 %v1208_v2, %v358_v49 }
  0x34   :  { %848 = vst [vmem:[#allocation7 + $0x110] sm:$0xff] %v592_v53  ;;  %v103_v53 = vld [vmem:[#allocation2 + $0x1e8] sm:$0xff]  ;;  %v361_v58 = vmul.f32 %v1206_v1, %v102_v50  ;;  %v616_v63 = vadd.f32 %v1208_v2, %v359_v52 }
  0x35   :  { %849 = vst [vmem:[#allocation7 + $0x118] sm:$0xff] %v593_v56  ;;  %v104_v56 = vld [vmem:[#allocation2 + $0x1f0] sm:$0xff]  ;;  %v362_v61 = vmul.f32 %v1206_v1, %v103_v53  ;;  %v617_v4 = vadd.f32 %v1208_v2, %v360_v55 }
  0x36   :  { %850 = vst [vmem:[#allocation7 + $0x120] sm:$0xff] %v594_v59  ;;  %v105_v59 = vld [vmem:[#allocation2 + $0x1f8] sm:$0xff]  ;;  %v363_v0 = vmul.f32 %v1206_v1, %v104_v56  ;;  %v618_v7 = vadd.f32 %v1208_v2, %v361_v58 }
  0x37   :  { %851 = vst [vmem:[#allocation7 + $0x128] sm:$0xff] %v595_v62  ;;  %v106_v62 = vld [vmem:[#allocation2 + $0x200] sm:$0xff]  ;;  %v364_v5 = vmul.f32 %v1206_v1, %v105_v59  ;;  %v619_v10 = vadd.f32 %v1208_v2, %v362_v61 }
  0x38   :  { %852 = vst [vmem:[#allocation7 + $0x130] sm:$0xff] %v596_v3  ;;  %v107_v3 = vld [vmem:[#allocation2 + $0x208] sm:$0xff]  ;;  %v365_v8 = vmul.f32 %v1206_v1, %v106_v62  ;;  %v620_v13 = vadd.f32 %v1208_v2, %v363_v0 }
  0x39   :  { %853 = vst [vmem:[#allocation7 + $0x138] sm:$0xff] %v597_v6  ;;  %v108_v6 = vld [vmem:[#allocation2 + $0x210] sm:$0xff]  ;;  %v366_v11 = vmul.f32 %v1206_v1, %v107_v3  ;;  %v621_v16 = vadd.f32 %v1208_v2, %v364_v5 }
  0x3a   :  { %854 = vst [vmem:[#allocation7 + $0x140] sm:$0xff] %v598_v9  ;;  %v109_v9 = vld [vmem:[#allocation2 + $0x218] sm:$0xff]  ;;  %v367_v14 = vmul.f32 %v1206_v1, %v108_v6  ;;  %v622_v19 = vadd.f32 %v1208_v2, %v365_v8 }
  0x3b   :  { %855 = vst [vmem:[#allocation7 + $0x148] sm:$0xff] %v599_v12  ;;  %v110_v12 = vld [vmem:[#allocation2 + $0x220] sm:$0xff]  ;;  %v368_v17 = vmul.f32 %v1206_v1, %v109_v9  ;;  %v623_v22 = vadd.f32 %v1208_v2, %v366_v11 }
  0x3c   :  { %856 = vst [vmem:[#allocation7 + $0x150] sm:$0xff] %v600_v15  ;;  %v111_v15 = vld [vmem:[#allocation2 + $0x228] sm:$0xff]  ;;  %v369_v20 = vmul.f32 %v1206_v1, %v110_v12  ;;  %v624_v25 = vadd.f32 %v1208_v2, %v367_v14 }
  0x3d   :  { %857 = vst [vmem:[#allocation7 + $0x158] sm:$0xff] %v601_v18  ;;  %v112_v18 = vld [vmem:[#allocation2 + $0x230] sm:$0xff]  ;;  %v370_v23 = vmul.f32 %v1206_v1, %v111_v15  ;;  %v625_v28 = vadd.f32 %v1208_v2, %v368_v17 }
  0x3e   :  { %858 = vst [vmem:[#allocation7 + $0x160] sm:$0xff] %v602_v21  ;;  %v113_v21 = vld [vmem:[#allocation2 + $0x238] sm:$0xff]  ;;  %v371_v26 = vmul.f32 %v1206_v1, %v112_v18  ;;  %v626_v31 = vadd.f32 %v1208_v2, %v369_v20 }
  0x3f   :  { %859 = vst [vmem:[#allocation7 + $0x168] sm:$0xff] %v603_v24  ;;  %v114_v24 = vld [vmem:[#allocation2 + $0x240] sm:$0xff]  ;;  %v372_v29 = vmul.f32 %v1206_v1, %v113_v21  ;;  %v627_v34 = vadd.f32 %v1208_v2, %v370_v23 }
  0x40   :  { %860 = vst [vmem:[#allocation7 + $0x170] sm:$0xff] %v604_v27  ;;  %v115_v27 = vld [vmem:[#allocation2 + $0x248] sm:$0xff]  ;;  %v373_v32 = vmul.f32 %v1206_v1, %v114_v24  ;;  %v628_v37 = vadd.f32 %v1208_v2, %v371_v26 }
  0x41   :  { %861 = vst [vmem:[#allocation7 + $0x178] sm:$0xff] %v605_v30  ;;  %v116_v30 = vld [vmem:[#allocation2 + $0x250] sm:$0xff]  ;;  %v374_v35 = vmul.f32 %v1206_v1, %v115_v27  ;;  %v629_v40 = vadd.f32 %v1208_v2, %v372_v29 }
  0x42   :  { %862 = vst [vmem:[#allocation7 + $0x180] sm:$0xff] %v606_v33  ;;  %v117_v33 = vld [vmem:[#allocation2 + $0x258] sm:$0xff]  ;;  %v375_v38 = vmul.f32 %v1206_v1, %v116_v30  ;;  %v630_v43 = vadd.f32 %v1208_v2, %v373_v32 }
  0x43   :  { %863 = vst [vmem:[#allocation7 + $0x188] sm:$0xff] %v607_v36  ;;  %v118_v36 = vld [vmem:[#allocation2 + $0x260] sm:$0xff]  ;;  %v376_v41 = vmul.f32 %v1206_v1, %v117_v33  ;;  %v631_v46 = vadd.f32 %v1208_v2, %v374_v35 }
  0x44   :  { %864 = vst [vmem:[#allocation7 + $0x190] sm:$0xff] %v608_v39  ;;  %v119_v39 = vld [vmem:[#allocation2 + $0x268] sm:$0xff]  ;;  %v377_v44 = vmul.f32 %v1206_v1, %v118_v36  ;;  %v632_v49 = vadd.f32 %v1208_v2, %v375_v38 }
  0x45   :  { %865 = vst [vmem:[#allocation7 + $0x198] sm:$0xff] %v609_v42  ;;  %v120_v42 = vld [vmem:[#allocation2 + $0x270] sm:$0xff]  ;;  %v378_v47 = vmul.f32 %v1206_v1, %v119_v39  ;;  %v633_v52 = vadd.f32 %v1208_v2, %v376_v41 }
  0x46   :  { %866 = vst [vmem:[#allocation7 + $0x1a0] sm:$0xff] %v610_v45  ;;  %v121_v45 = vld [vmem:[#allocation2 + $0x278] sm:$0xff]  ;;  %v379_v50 = vmul.f32 %v1206_v1, %v120_v42  ;;  %v634_v55 = vadd.f32 %v1208_v2, %v377_v44 }
  0x47   :  { %867 = vst [vmem:[#allocation7 + $0x1a8] sm:$0xff] %v611_v48  ;;  %v122_v48 = vld [vmem:[#allocation2 + $0x280] sm:$0xff]  ;;  %v380_v53 = vmul.f32 %v1206_v1, %v121_v45  ;;  %v635_v58 = vadd.f32 %v1208_v2, %v378_v47 }
  0x48   :  { %868 = vst [vmem:[#allocation7 + $0x1b0] sm:$0xff] %v612_v51  ;;  %v123_v51 = vld [vmem:[#allocation2 + $0x288] sm:$0xff]  ;;  %v381_v56 = vmul.f32 %v1206_v1, %v122_v48  ;;  %v636_v61 = vadd.f32 %v1208_v2, %v379_v50 }
  0x49   :  { %869 = vst [vmem:[#allocation7 + $0x1b8] sm:$0xff] %v613_v54  ;;  %v124_v54 = vld [vmem:[#allocation2 + $0x290] sm:$0xff]  ;;  %v382_v59 = vmul.f32 %v1206_v1, %v123_v51  ;;  %v637_v0 = vadd.f32 %v1208_v2, %v380_v53 }
  0x4a   :  { %870 = vst [vmem:[#allocation7 + $0x1c0] sm:$0xff] %v614_v57  ;;  %v125_v57 = vld [vmem:[#allocation2 + $0x298] sm:$0xff]  ;;  %v383_v62 = vmul.f32 %v1206_v1, %v124_v54  ;;  %v638_v5 = vadd.f32 %v1208_v2, %v381_v56 }
  0x4b   :  { %871 = vst [vmem:[#allocation7 + $0x1c8] sm:$0xff] %v615_v60  ;;  %v126_v60 = vld [vmem:[#allocation2 + $0x2a0] sm:$0xff]  ;;  %v384_v3 = vmul.f32 %v1206_v1, %v125_v57  ;;  %v639_v8 = vadd.f32 %v1208_v2, %v382_v59 }
  0x4c   :  { %872 = vst [vmem:[#allocation7 + $0x1d0] sm:$0xff] %v616_v63  ;;  %v127_v63 = vld [vmem:[#allocation2 + $0x2a8] sm:$0xff]  ;;  %v385_v6 = vmul.f32 %v1206_v1, %v126_v60  ;;  %v640_v11 = vadd.f32 %v1208_v2, %v383_v62 }
  0x4d   :  { %873 = vst [vmem:[#allocation7 + $0x1d8] sm:$0xff] %v617_v4  ;;  %v128_v4 = vld [vmem:[#allocation2 + $0x2b0] sm:$0xff]  ;;  %v386_v9 = vmul.f32 %v1206_v1, %v127_v63  ;;  %v641_v14 = vadd.f32 %v1208_v2, %v384_v3 }
  0x4e   :  { %874 = vst [vmem:[#allocation7 + $0x1e0] sm:$0xff] %v618_v7  ;;  %v129_v7 = vld [vmem:[#allocation2 + $0x2b8] sm:$0xff]  ;;  %v387_v12 = vmul.f32 %v1206_v1, %v128_v4  ;;  %v642_v17 = vadd.f32 %v1208_v2, %v385_v6 }
  0x4f   :  { %875 = vst [vmem:[#allocation7 + $0x1e8] sm:$0xff] %v619_v10  ;;  %v130_v10 = vld [vmem:[#allocation2 + $0x2c0] sm:$0xff]  ;;  %v388_v15 = vmul.f32 %v1206_v1, %v129_v7  ;;  %v643_v20 = vadd.f32 %v1208_v2, %v386_v9 }
  0x50   :  { %876 = vst [vmem:[#allocation7 + $0x1f0] sm:$0xff] %v620_v13  ;;  %v131_v13 = vld [vmem:[#allocation2 + $0x2c8] sm:$0xff]  ;;  %v389_v18 = vmul.f32 %v1206_v1, %v130_v10  ;;  %v644_v23 = vadd.f32 %v1208_v2, %v387_v12 }
  0x51   :  { %877 = vst [vmem:[#allocation7 + $0x1f8] sm:$0xff] %v621_v16  ;;  %v132_v16 = vld [vmem:[#allocation2 + $0x2d0] sm:$0xff]  ;;  %v390_v21 = vmul.f32 %v1206_v1, %v131_v13  ;;  %v645_v26 = vadd.f32 %v1208_v2, %v388_v15 }
  0x52   :  { %878 = vst [vmem:[#allocation7 + $0x200] sm:$0xff] %v622_v19  ;;  %v133_v19 = vld [vmem:[#allocation2 + $0x2d8] sm:$0xff]  ;;  %v391_v24 = vmul.f32 %v1206_v1, %v132_v16  ;;  %v646_v29 = vadd.f32 %v1208_v2, %v389_v18 }
  0x53   :  { %879 = vst [vmem:[#allocation7 + $0x208] sm:$0xff] %v623_v22  ;;  %v134_v22 = vld [vmem:[#allocation2 + $0x2e0] sm:$0xff]  ;;  %v392_v27 = vmul.f32 %v1206_v1, %v133_v19  ;;  %v647_v32 = vadd.f32 %v1208_v2, %v390_v21 }
  0x54   :  { %880 = vst [vmem:[#allocation7 + $0x210] sm:$0xff] %v624_v25  ;;  %v135_v25 = vld [vmem:[#allocation2 + $0x2e8] sm:$0xff]  ;;  %v393_v30 = vmul.f32 %v1206_v1, %v134_v22  ;;  %v648_v35 = vadd.f32 %v1208_v2, %v391_v24 }
  0x55   :  { %881 = vst [vmem:[#allocation7 + $0x218] sm:$0xff] %v625_v28  ;;  %v136_v28 = vld [vmem:[#allocation2 + $0x2f0] sm:$0xff]  ;;  %v394_v33 = vmul.f32 %v1206_v1, %v135_v25  ;;  %v649_v38 = vadd.f32 %v1208_v2, %v392_v27 }
  0x56   :  { %882 = vst [vmem:[#allocation7 + $0x220] sm:$0xff] %v626_v31  ;;  %v137_v31 = vld [vmem:[#allocation2 + $0x2f8] sm:$0xff]  ;;  %v395_v36 = vmul.f32 %v1206_v1, %v136_v28  ;;  %v650_v41 = vadd.f32 %v1208_v2, %v393_v30 }
  0x57   :  { %883 = vst [vmem:[#allocation7 + $0x228] sm:$0xff] %v627_v34  ;;  %v138_v34 = vld [vmem:[#allocation2 + $0x300] sm:$0xff]  ;;  %v396_v39 = vmul.f32 %v1206_v1, %v137_v31  ;;  %v651_v44 = vadd.f32 %v1208_v2, %v394_v33 }
  0x58   :  { %884 = vst [vmem:[#allocation7 + $0x230] sm:$0xff] %v628_v37  ;;  %v139_v37 = vld [vmem:[#allocation2 + $0x308] sm:$0xff]  ;;  %v397_v42 = vmul.f32 %v1206_v1, %v138_v34  ;;  %v652_v47 = vadd.f32 %v1208_v2, %v395_v36 }
  0x59   :  { %885 = vst [vmem:[#allocation7 + $0x238] sm:$0xff] %v629_v40  ;;  %v140_v40 = vld [vmem:[#allocation2 + $0x310] sm:$0xff]  ;;  %v398_v45 = vmul.f32 %v1206_v1, %v139_v37  ;;  %v653_v50 = vadd.f32 %v1208_v2, %v396_v39 }
  0x5a   :  { %886 = vst [vmem:[#allocation7 + $0x240] sm:$0xff] %v630_v43  ;;  %v141_v43 = vld [vmem:[#allocation2 + $0x318] sm:$0xff]  ;;  %v399_v48 = vmul.f32 %v1206_v1, %v140_v40  ;;  %v654_v53 = vadd.f32 %v1208_v2, %v397_v42 }
  0x5b   :  { %887 = vst [vmem:[#allocation7 + $0x248] sm:$0xff] %v631_v46  ;;  %v142_v46 = vld [vmem:[#allocation2 + $0x320] sm:$0xff]  ;;  %v400_v51 = vmul.f32 %v1206_v1, %v141_v43  ;;  %v655_v56 = vadd.f32 %v1208_v2, %v398_v45 }
  0x5c   :  { %888 = vst [vmem:[#allocation7 + $0x250] sm:$0xff] %v632_v49  ;;  %v143_v49 = vld [vmem:[#allocation2 + $0x328] sm:$0xff]  ;;  %v401_v54 = vmul.f32 %v1206_v1, %v142_v46  ;;  %v656_v59 = vadd.f32 %v1208_v2, %v399_v48 }
  0x5d   :  { %889 = vst [vmem:[#allocation7 + $0x258] sm:$0xff] %v633_v52  ;;  %v144_v52 = vld [vmem:[#allocation2 + $0x330] sm:$0xff]  ;;  %v402_v57 = vmul.f32 %v1206_v1, %v143_v49  ;;  %v657_v62 = vadd.f32 %v1208_v2, %v400_v51 }
  0x5e   :  { %890 = vst [vmem:[#allocation7 + $0x260] sm:$0xff] %v634_v55  ;;  %v145_v55 = vld [vmem:[#allocation2 + $0x338] sm:$0xff]  ;;  %v403_v60 = vmul.f32 %v1206_v1, %v144_v52  ;;  %v658_v3 = vadd.f32 %v1208_v2, %v401_v54 }
  0x5f   :  { %891 = vst [vmem:[#allocation7 + $0x268] sm:$0xff] %v635_v58  ;;  %v146_v58 = vld [vmem:[#allocation2 + $0x340] sm:$0xff]  ;;  %v404_v63 = vmul.f32 %v1206_v1, %v145_v55  ;;  %v659_v6 = vadd.f32 %v1208_v2, %v402_v57 }
  0x60   :  { %892 = vst [vmem:[#allocation7 + $0x270] sm:$0xff] %v636_v61  ;;  %v147_v61 = vld [vmem:[#allocation2 + $0x348] sm:$0xff]  ;;  %v405_v4 = vmul.f32 %v1206_v1, %v146_v58  ;;  %v660_v9 = vadd.f32 %v1208_v2, %v403_v60 }
  0x61   :  { %893 = vst [vmem:[#allocation7 + $0x278] sm:$0xff] %v637_v0  ;;  %v148_v0 = vld [vmem:[#allocation2 + $0x350] sm:$0xff]  ;;  %v406_v7 = vmul.f32 %v1206_v1, %v147_v61  ;;  %v661_v12 = vadd.f32 %v1208_v2, %v404_v63 }
  0x62   :  { %894 = vst [vmem:[#allocation7 + $0x280] sm:$0xff] %v638_v5  ;;  %v149_v5 = vld [vmem:[#allocation2 + $0x358] sm:$0xff]  ;;  %v407_v10 = vmul.f32 %v1206_v1, %v148_v0  ;;  %v662_v15 = vadd.f32 %v1208_v2, %v405_v4 }
  0x63   :  { %895 = vst [vmem:[#allocation7 + $0x288] sm:$0xff] %v639_v8  ;;  %v150_v8 = vld [vmem:[#allocation2 + $0x360] sm:$0xff]  ;;  %v408_v13 = vmul.f32 %v1206_v1, %v149_v5  ;;  %v663_v18 = vadd.f32 %v1208_v2, %v406_v7 }
  0x64   :  { %896 = vst [vmem:[#allocation7 + $0x290] sm:$0xff] %v640_v11  ;;  %v151_v11 = vld [vmem:[#allocation2 + $0x368] sm:$0xff]  ;;  %v409_v16 = vmul.f32 %v1206_v1, %v150_v8  ;;  %v664_v21 = vadd.f32 %v1208_v2, %v407_v10 }
  0x65   :  { %897 = vst [vmem:[#allocation7 + $0x298] sm:$0xff] %v641_v14  ;;  %v152_v14 = vld [vmem:[#allocation2 + $0x370] sm:$0xff]  ;;  %v410_v19 = vmul.f32 %v1206_v1, %v151_v11  ;;  %v665_v24 = vadd.f32 %v1208_v2, %v408_v13 }
  0x66   :  { %898 = vst [vmem:[#allocation7 + $0x2a0] sm:$0xff] %v642_v17  ;;  %v153_v17 = vld [vmem:[#allocation2 + $0x378] sm:$0xff]  ;;  %v411_v22 = vmul.f32 %v1206_v1, %v152_v14  ;;  %v666_v27 = vadd.f32 %v1208_v2, %v409_v16 }
  0x67   :  { %899 = vst [vmem:[#allocation7 + $0x2a8] sm:$0xff] %v643_v20  ;;  %v154_v20 = vld [vmem:[#allocation2 + $0x380] sm:$0xff]  ;;  %v412_v25 = vmul.f32 %v1206_v1, %v153_v17  ;;  %v667_v30 = vadd.f32 %v1208_v2, %v410_v19 }
  0x68   :  { %900 = vst [vmem:[#allocation7 + $0x2b0] sm:$0xff] %v644_v23  ;;  %v155_v23 = vld [vmem:[#allocation2 + $0x388] sm:$0xff]  ;;  %v413_v28 = vmul.f32 %v1206_v1, %v154_v20  ;;  %v668_v33 = vadd.f32 %v1208_v2, %v411_v22  ;;  %v1466_v19 = vld [vmem:[#allocation5 + $0x1] ss:$0 sm:$0xff] }
  0x69   :  { %901 = vst [vmem:[#allocation7 + $0x2b8] sm:$0xff] %v645_v26  ;;  %v156_v26 = vld [vmem:[#allocation2 + $0x390] sm:$0xff]  ;;  %v414_v31 = vmul.f32 %v1206_v1, %v155_v23  ;;  %v669_v36 = vadd.f32 %v1208_v2, %v412_v25  ;;  %v175_v23 = vld [vmem:[#allocation2 + $0x428] sm:$0xff] }
  0x6a   :  { %902 = vst [vmem:[#allocation7 + $0x2c0] sm:$0xff] %v646_v29  ;;  %v157_v29 = vld [vmem:[#allocation2 + $0x398] sm:$0xff]  ;;  %v415_v34 = vmul.f32 %v1206_v1, %v156_v26  ;;  %v670_v39 = vadd.f32 %v1208_v2, %v413_v28  ;;  %v176_v26 = vld [vmem:[#allocation2 + $0x430] sm:$0xff] }
  0x6b   :  { %903 = vst [vmem:[#allocation7 + $0x2c8] sm:$0xff] %v647_v32  ;;  %v158_v32 = vld [vmem:[#allocation2 + $0x3a0] sm:$0xff]  ;;  %v416_v37 = vmul.f32 %v1206_v1, %v157_v29  ;;  %v671_v42 = vadd.f32 %v1208_v2, %v414_v31 }
  0x6c   :  { %904 = vst [vmem:[#allocation7 + $0x2d0] sm:$0xff] %v648_v35  ;;  %v159_v35 = vld [vmem:[#allocation2 + $0x3a8] sm:$0xff]  ;;  %v417_v40 = vmul.f32 %v1206_v1, %v158_v32  ;;  %v672_v45 = vadd.f32 %v1208_v2, %v415_v34 }
  0x6d   :  { %905 = vst [vmem:[#allocation7 + $0x2d8] sm:$0xff] %v649_v38  ;;  %v160_v38 = vld [vmem:[#allocation2 + $0x3b0] sm:$0xff]  ;;  %v418_v43 = vmul.f32 %v1206_v1, %v159_v35  ;;  %v673_v48 = vadd.f32 %v1208_v2, %v416_v37 }
  0x6e   :  { %906 = vst [vmem:[#allocation7 + $0x2e0] sm:$0xff] %v650_v41  ;;  %v161_v41 = vld [vmem:[#allocation2 + $0x3b8] sm:$0xff]  ;;  %v419_v46 = vmul.f32 %v1206_v1, %v160_v38  ;;  %v674_v51 = vadd.f32 %v1208_v2, %v417_v40 }
  0x6f   :  { %907 = vst [vmem:[#allocation7 + $0x2e8] sm:$0xff] %v651_v44  ;;  %v162_v44 = vld [vmem:[#allocation2 + $0x3c0] sm:$0xff]  ;;  %v420_v49 = vmul.f32 %v1206_v1, %v161_v41  ;;  %v675_v54 = vadd.f32 %v1208_v2, %v418_v43 }
  0x70   :  { %908 = vst [vmem:[#allocation7 + $0x2f0] sm:$0xff] %v652_v47  ;;  %v163_v47 = vld [vmem:[#allocation2 + $0x3c8] sm:$0xff]  ;;  %v421_v52 = vmul.f32 %v1206_v1, %v162_v44  ;;  %v676_v57 = vadd.f32 %v1208_v2, %v419_v46 }
  0x71   :  { %909 = vst [vmem:[#allocation7 + $0x2f8] sm:$0xff] %v653_v50  ;;  %v164_v50 = vld [vmem:[#allocation2 + $0x3d0] sm:$0xff]  ;;  %v422_v55 = vmul.f32 %v1206_v1, %v163_v47  ;;  %v677_v60 = vadd.f32 %v1208_v2, %v420_v49 }
  0x72   :  { %910 = vst [vmem:[#allocation7 + $0x300] sm:$0xff] %v654_v53  ;;  %v165_v53 = vld [vmem:[#allocation2 + $0x3d8] sm:$0xff]  ;;  %v423_v58 = vmul.f32 %v1206_v1, %v164_v50  ;;  %v678_v63 = vadd.f32 %v1208_v2, %v421_v52 }
  0x73   :  { %911 = vst [vmem:[#allocation7 + $0x308] sm:$0xff] %v655_v56  ;;  %v166_v56 = vld [vmem:[#allocation2 + $0x3e0] sm:$0xff]  ;;  %v424_v61 = vmul.f32 %v1206_v1, %v165_v53  ;;  %v679_v4 = vadd.f32 %v1208_v2, %v422_v55 }
  0x74   :  { %912 = vst [vmem:[#allocation7 + $0x310] sm:$0xff] %v656_v59  ;;  %v167_v59 = vld [vmem:[#allocation2 + $0x3e8] sm:$0xff]  ;;  %v425_v0 = vmul.f32 %v1206_v1, %v166_v56  ;;  %v680_v7 = vadd.f32 %v1208_v2, %v423_v58 }
  0x75   :  { %913 = vst [vmem:[#allocation7 + $0x318] sm:$0xff] %v657_v62  ;;  %v168_v62 = vld [vmem:[#allocation2 + $0x3f0] sm:$0xff]  ;;  %v426_v5 = vmul.f32 %v1206_v1, %v167_v59  ;;  %v681_v10 = vadd.f32 %v1208_v2, %v424_v61 }
  0x76   :  { %914 = vst [vmem:[#allocation7 + $0x320] sm:$0xff] %v658_v3  ;;  %v169_v3 = vld [vmem:[#allocation2 + $0x3f8] sm:$0xff]  ;;  %v427_v8 = vmul.f32 %v1206_v1, %v168_v62  ;;  %v682_v13 = vadd.f32 %v1208_v2, %v425_v0 }
  0x77   :  { %915 = vst [vmem:[#allocation7 + $0x328] sm:$0xff] %v659_v6  ;;  %v170_v6 = vld [vmem:[#allocation2 + $0x400] sm:$0xff]  ;;  %v428_v11 = vmul.f32 %v1206_v1, %v169_v3  ;;  %v683_v16 = vadd.f32 %v1208_v2, %v426_v5 }
  0x78   :  { %916 = vst [vmem:[#allocation7 + $0x330] sm:$0xff] %v660_v9  ;;  %v171_v9 = vld [vmem:[#allocation2 + $0x408] sm:$0xff]  ;;  %v429_v14 = vmul.f32 %v1206_v1, %v170_v6  ;;  %v684_v20 = vadd.f32 %v1466_v19, %v427_v8 }
  0x79   :  { %917 = vst [vmem:[#allocation7 + $0x338] sm:$0xff] %v661_v12  ;;  %v172_v12 = vld [vmem:[#allocation2 + $0x410] sm:$0xff]  ;;  %v430_v17 = vmul.f32 %v1206_v1, %v171_v9 }
  0x7a   :  { %918 = vst [vmem:[#allocation7 + $0x340] sm:$0xff] %v662_v15  ;;  %v173_v15 = vld [vmem:[#allocation2 + $0x418] sm:$0xff]  ;;  %v686_v1 = vadd.f32 %v1466_v19, %v429_v14 }
  0x7b   :  { %919 = vst [vmem:[#allocation7 + $0x348] sm:$0xff] %v663_v18  ;;  %v174_v18 = vld [vmem:[#allocation2 + $0x420] sm:$0xff]  ;;  %v687_v28 = vadd.f32 %v1466_v19, %v430_v17 }
  0x7c   :  { %920 = vst [vmem:[#allocation7 + $0x350] sm:$0xff] %v664_v21  ;;  %v1469_v21 = vld [vmem:[#allocation5] ss:$0 sm:$0xff] }
  0x7d   :  { %921 = vst [vmem:[#allocation7 + $0x358] sm:$0xff] %v665_v24  ;;  %v431_v22 = vmul.f32 %v1469_v21, %v172_v12  ;;  %v685_v24 = vadd.f32 %v1466_v19, %v428_v11  ;;  %v432_v25 = vmul.f32 %v1469_v21, %v173_v15  ;;  %v433_v2 = vmul.f32 %v1469_v21, %v174_v18 }
  0x7e   :  { %922 = vst [vmem:[#allocation7 + $0x360] sm:$0xff] %v666_v27  ;;  %v177_v27 = vld [vmem:[#allocation2 + $0x438] sm:$0xff]  ;;  %v434_v29 = vmul.f32 %v1469_v21, %v175_v23  ;;  %v435_v32 = vmul.f32 %v1469_v21, %v176_v26 }
  0x7f   :  { %923 = vst [vmem:[#allocation7 + $0x368] sm:$0xff] %v667_v30  ;;  %v178_v30 = vld [vmem:[#allocation2 + $0x440] sm:$0xff]  ;;  %v688_v31 = vadd.f32 %v1466_v19, %v431_v22  ;;  %v689_v34 = vadd.f32 %v1466_v19, %v432_v25  ;;  %v436_v35 = vmul.f32 %v1469_v21, %v177_v27  ;;  %v690_v37 = vadd.f32 %v1466_v19, %v433_v2 }
  0x80   :  { %924 = vst [vmem:[#allocation7 + $0x370] sm:$0xff] %v668_v33  ;;  %v179_v33 = vld [vmem:[#allocation2 + $0x448] sm:$0xff]  ;;  %v437_v38 = vmul.f32 %v1469_v21, %v178_v30  ;;  %v691_v40 = vadd.f32 %v1466_v19, %v434_v29  ;;  %v692_v43 = vadd.f32 %v1466_v19, %v435_v32 }
  0x81   :  { %925 = vst [vmem:[#allocation7 + $0x378] sm:$0xff] %v669_v36  ;;  %v180_v36 = vld [vmem:[#allocation2 + $0x450] sm:$0xff]  ;;  %v438_v41 = vmul.f32 %v1469_v21, %v179_v33  ;;  %v693_v46 = vadd.f32 %v1466_v19, %v436_v35 }
  0x82   :  { %926 = vst [vmem:[#allocation7 + $0x380] sm:$0xff] %v670_v39  ;;  %v181_v39 = vld [vmem:[#allocation2 + $0x458] sm:$0xff]  ;;  %v439_v44 = vmul.f32 %v1469_v21, %v180_v36  ;;  %v694_v49 = vadd.f32 %v1466_v19, %v437_v38 }
  0x83   :  { %927 = vst [vmem:[#allocation7 + $0x388] sm:$0xff] %v671_v42  ;;  %v182_v42 = vld [vmem:[#allocation2 + $0x460] sm:$0xff]  ;;  %v440_v47 = vmul.f32 %v1469_v21, %v181_v39  ;;  %v695_v52 = vadd.f32 %v1466_v19, %v438_v41 }
  0x84   :  { %928 = vst [vmem:[#allocation7 + $0x390] sm:$0xff] %v672_v45  ;;  %v183_v45 = vld [vmem:[#allocation2 + $0x468] sm:$0xff]  ;;  %v441_v50 = vmul.f32 %v1469_v21, %v182_v42  ;;  %v696_v55 = vadd.f32 %v1466_v19, %v439_v44 }
  0x85   :  { %929 = vst [vmem:[#allocation7 + $0x398] sm:$0xff] %v673_v48  ;;  %v184_v48 = vld [vmem:[#allocation2 + $0x470] sm:$0xff]  ;;  %v442_v53 = vmul.f32 %v1469_v21, %v183_v45  ;;  %v697_v58 = vadd.f32 %v1466_v19, %v440_v47 }
  0x86   :  { %930 = vst [vmem:[#allocation7 + $0x3a0] sm:$0xff] %v674_v51  ;;  %v185_v51 = vld [vmem:[#allocation2 + $0x478] sm:$0xff]  ;;  %v443_v56 = vmul.f32 %v1469_v21, %v184_v48  ;;  %v698_v61 = vadd.f32 %v1466_v19, %v441_v50 }
  0x87   :  { %931 = vst [vmem:[#allocation7 + $0x3a8] sm:$0xff] %v675_v54  ;;  %v186_v54 = vld [vmem:[#allocation2 + $0x480] sm:$0xff]  ;;  %v444_v59 = vmul.f32 %v1469_v21, %v185_v51  ;;  %v699_v0 = vadd.f32 %v1466_v19, %v442_v53 }
  0x88   :  { %932 = vst [vmem:[#allocation7 + $0x3b0] sm:$0xff] %v676_v57  ;;  %v187_v57 = vld [vmem:[#allocation2 + $0x488] sm:$0xff]  ;;  %v445_v62 = vmul.f32 %v1469_v21, %v186_v54  ;;  %v700_v5 = vadd.f32 %v1466_v19, %v443_v56 }
  0x89   :  { %933 = vst [vmem:[#allocation7 + $0x3b8] sm:$0xff] %v677_v60  ;;  %v188_v60 = vld [vmem:[#allocation2 + $0x490] sm:$0xff]  ;;  %v446_v3 = vmul.f32 %v1469_v21, %v187_v57  ;;  %v701_v8 = vadd.f32 %v1466_v19, %v444_v59 }
  0x8a   :  { %934 = vst [vmem:[#allocation7 + $0x3c0] sm:$0xff] %v678_v63  ;;  %v189_v63 = vld [vmem:[#allocation2 + $0x498] sm:$0xff]  ;;  %v447_v6 = vmul.f32 %v1469_v21, %v188_v60  ;;  %v702_v11 = vadd.f32 %v1466_v19, %v445_v62 }
  0x8b   :  { %935 = vst [vmem:[#allocation7 + $0x3c8] sm:$0xff] %v679_v4  ;;  %v190_v4 = vld [vmem:[#allocation2 + $0x4a0] sm:$0xff]  ;;  %v448_v9 = vmul.f32 %v1469_v21, %v189_v63  ;;  %v703_v14 = vadd.f32 %v1466_v19, %v446_v3 }
  0x8c   :  { %936 = vst [vmem:[#allocation7 + $0x3d0] sm:$0xff] %v680_v7  ;;  %v191_v7 = vld [vmem:[#allocation2 + $0x4a8] sm:$0xff]  ;;  %v449_v12 = vmul.f32 %v1469_v21, %v190_v4  ;;  %v704_v17 = vadd.f32 %v1466_v19, %v447_v6 }
  0x8d   :  { %937 = vst [vmem:[#allocation7 + $0x3d8] sm:$0xff] %v681_v10  ;;  %v192_v10 = vld [vmem:[#allocation2 + $0x4b0] sm:$0xff]  ;;  %v450_v15 = vmul.f32 %v1469_v21, %v191_v7  ;;  %v705_v22 = vadd.f32 %v1466_v19, %v448_v9 }
  0x8e   :  { %938 = vst [vmem:[#allocation7 + $0x3e0] sm:$0xff] %v682_v13  ;;  %v193_v13 = vld [vmem:[#allocation2 + $0x4b8] sm:$0xff]  ;;  %v451_v18 = vmul.f32 %v1469_v21, %v192_v10  ;;  %v706_v25 = vadd.f32 %v1466_v19, %v449_v12 }
  0x8f   :  { %939 = vst [vmem:[#allocation7 + $0x3e8] sm:$0xff] %v683_v16  ;;  %v194_v16 = vld [vmem:[#allocation2 + $0x4c0] sm:$0xff]  ;;  %v452_v23 = vmul.f32 %v1469_v21, %v193_v13  ;;  %v707_v2 = vadd.f32 %v1466_v19, %v450_v15 }
  0x90   :  { %940 = vst [vmem:[#allocation7 + $0x3f0] sm:$0xff] %v684_v20  ;;  %v195_v20 = vld [vmem:[#allocation2 + $0x4c8] sm:$0xff]  ;;  %v453_v26 = vmul.f32 %v1469_v21, %v194_v16  ;;  %v708_v29 = vadd.f32 %v1466_v19, %v451_v18 }
  0x91   :  { %941 = vst [vmem:[#allocation7 + $0x3f8] sm:$0xff] %v685_v24  ;;  %v196_v24 = vld [vmem:[#allocation2 + $0x4d0] sm:$0xff]  ;;  %v454_v27 = vmul.f32 %v1469_v21, %v195_v20  ;;  %v709_v32 = vadd.f32 %v1466_v19, %v452_v23 }
  0x92   :  { %942 = vst [vmem:[#allocation7 + $0x400] sm:$0xff] %v686_v1  ;;  %v197_v1 = vld [vmem:[#allocation2 + $0x4d8] sm:$0xff]  ;;  %v455_v30 = vmul.f32 %v1469_v21, %v196_v24  ;;  %v710_v35 = vadd.f32 %v1466_v19, %v453_v26 }
  0x93   :  { %943 = vst [vmem:[#allocation7 + $0x408] sm:$0xff] %v687_v28  ;;  %v198_v28 = vld [vmem:[#allocation2 + $0x4e0] sm:$0xff]  ;;  %v456_v33 = vmul.f32 %v1469_v21, %v197_v1  ;;  %v711_v38 = vadd.f32 %v1466_v19, %v454_v27 }
  0x94   :  { %944 = vst [vmem:[#allocation7 + $0x410] sm:$0xff] %v688_v31  ;;  %v199_v31 = vld [vmem:[#allocation2 + $0x4e8] sm:$0xff]  ;;  %v457_v36 = vmul.f32 %v1469_v21, %v198_v28  ;;  %v712_v41 = vadd.f32 %v1466_v19, %v455_v30 }
  0x95   :  { %945 = vst [vmem:[#allocation7 + $0x418] sm:$0xff] %v689_v34  ;;  %v200_v34 = vld [vmem:[#allocation2 + $0x4f0] sm:$0xff]  ;;  %v458_v39 = vmul.f32 %v1469_v21, %v199_v31  ;;  %v713_v44 = vadd.f32 %v1466_v19, %v456_v33 }
  0x96   :  { %946 = vst [vmem:[#allocation7 + $0x420] sm:$0xff] %v690_v37  ;;  %v201_v37 = vld [vmem:[#allocation2 + $0x4f8] sm:$0xff]  ;;  %v459_v42 = vmul.f32 %v1469_v21, %v200_v34  ;;  %v714_v47 = vadd.f32 %v1466_v19, %v457_v36 }
  0x97   :  { %947 = vst [vmem:[#allocation7 + $0x428] sm:$0xff] %v691_v40  ;;  %v202_v40 = vld [vmem:[#allocation2 + $0x500] sm:$0xff]  ;;  %v460_v45 = vmul.f32 %v1469_v21, %v201_v37  ;;  %v715_v50 = vadd.f32 %v1466_v19, %v458_v39 }
  0x98   :  { %948 = vst [vmem:[#allocation7 + $0x430] sm:$0xff] %v692_v43  ;;  %v203_v43 = vld [vmem:[#allocation2 + $0x508] sm:$0xff]  ;;  %v461_v48 = vmul.f32 %v1469_v21, %v202_v40  ;;  %v716_v53 = vadd.f32 %v1466_v19, %v459_v42 }
  0x99   :  { %949 = vst [vmem:[#allocation7 + $0x438] sm:$0xff] %v693_v46  ;;  %v204_v46 = vld [vmem:[#allocation2 + $0x510] sm:$0xff]  ;;  %v462_v51 = vmul.f32 %v1469_v21, %v203_v43  ;;  %v717_v56 = vadd.f32 %v1466_v19, %v460_v45 }
  0x9a   :  { %950 = vst [vmem:[#allocation7 + $0x440] sm:$0xff] %v694_v49  ;;  %v205_v49 = vld [vmem:[#allocation2 + $0x518] sm:$0xff]  ;;  %v463_v54 = vmul.f32 %v1469_v21, %v204_v46  ;;  %v718_v59 = vadd.f32 %v1466_v19, %v461_v48 }
  0x9b   :  { %951 = vst [vmem:[#allocation7 + $0x448] sm:$0xff] %v695_v52  ;;  %v206_v52 = vld [vmem:[#allocation2 + $0x520] sm:$0xff]  ;;  %v464_v57 = vmul.f32 %v1469_v21, %v205_v49  ;;  %v719_v62 = vadd.f32 %v1466_v19, %v462_v51 }
  0x9c   :  { %952 = vst [vmem:[#allocation7 + $0x450] sm:$0xff] %v696_v55  ;;  %v207_v55 = vld [vmem:[#allocation2 + $0x528] sm:$0xff]  ;;  %v465_v60 = vmul.f32 %v1469_v21, %v206_v52  ;;  %v720_v3 = vadd.f32 %v1466_v19, %v463_v54 }
  0x9d   :  { %953 = vst [vmem:[#allocation7 + $0x458] sm:$0xff] %v697_v58  ;;  %v208_v58 = vld [vmem:[#allocation2 + $0x530] sm:$0xff]  ;;  %v466_v63 = vmul.f32 %v1469_v21, %v207_v55  ;;  %v721_v6 = vadd.f32 %v1466_v19, %v464_v57 }
  0x9e   :  { %954 = vst [vmem:[#allocation7 + $0x460] sm:$0xff] %v698_v61  ;;  %v209_v61 = vld [vmem:[#allocation2 + $0x538] sm:$0xff]  ;;  %v467_v4 = vmul.f32 %v1469_v21, %v208_v58  ;;  %v722_v9 = vadd.f32 %v1466_v19, %v465_v60 }
  0x9f   :  { %955 = vst [vmem:[#allocation7 + $0x468] sm:$0xff] %v699_v0  ;;  %v210_v0 = vld [vmem:[#allocation2 + $0x540] sm:$0xff]  ;;  %v468_v7 = vmul.f32 %v1469_v21, %v209_v61  ;;  %v723_v12 = vadd.f32 %v1466_v19, %v466_v63 }
  0xa0   :  { %956 = vst [vmem:[#allocation7 + $0x470] sm:$0xff] %v700_v5  ;;  %v211_v5 = vld [vmem:[#allocation2 + $0x548] sm:$0xff]  ;;  %v469_v10 = vmul.f32 %v1469_v21, %v210_v0  ;;  %v724_v15 = vadd.f32 %v1466_v19, %v467_v4 }
  0xa1   :  { %957 = vst [vmem:[#allocation7 + $0x478] sm:$0xff] %v701_v8  ;;  %v212_v8 = vld [vmem:[#allocation2 + $0x550] sm:$0xff]  ;;  %v470_v13 = vmul.f32 %v1469_v21, %v211_v5  ;;  %v725_v18 = vadd.f32 %v1466_v19, %v468_v7 }
  0xa2   :  { %958 = vst [vmem:[#allocation7 + $0x480] sm:$0xff] %v702_v11  ;;  %v213_v11 = vld [vmem:[#allocation2 + $0x558] sm:$0xff]  ;;  %v471_v16 = vmul.f32 %v1469_v21, %v212_v8  ;;  %v726_v23 = vadd.f32 %v1466_v19, %v469_v10 }
  0xa3   :  { %959 = vst [vmem:[#allocation7 + $0x488] sm:$0xff] %v703_v14  ;;  %v214_v14 = vld [vmem:[#allocation2 + $0x560] sm:$0xff]  ;;  %v472_v20 = vmul.f32 %v1469_v21, %v213_v11  ;;  %v727_v26 = vadd.f32 %v1466_v19, %v470_v13 }
  0xa4   :  { %960 = vst [vmem:[#allocation7 + $0x490] sm:$0xff] %v704_v17  ;;  %v215_v17 = vld [vmem:[#allocation2 + $0x568] sm:$0xff]  ;;  %v473_v24 = vmul.f32 %v1469_v21, %v214_v14  ;;  %v728_v27 = vadd.f32 %v1466_v19, %v471_v16 }
  0xa5   :  { %961 = vst [vmem:[#allocation7 + $0x498] sm:$0xff] %v705_v22  ;;  %v216_v22 = vld [vmem:[#allocation2 + $0x570] sm:$0xff]  ;;  %v474_v1 = vmul.f32 %v1469_v21, %v215_v17  ;;  %v729_v30 = vadd.f32 %v1466_v19, %v472_v20 }
  0xa6   :  { %962 = vst [vmem:[#allocation7 + $0x4a0] sm:$0xff] %v706_v25  ;;  %v217_v25 = vld [vmem:[#allocation2 + $0x578] sm:$0xff]  ;;  %v475_v28 = vmul.f32 %v1469_v21, %v216_v22  ;;  %v730_v33 = vadd.f32 %v1466_v19, %v473_v24 }
  0xa7   :  { %963 = vst [vmem:[#allocation7 + $0x4a8] sm:$0xff] %v707_v2  ;;  %v218_v2 = vld [vmem:[#allocation2 + $0x580] sm:$0xff]  ;;  %v476_v31 = vmul.f32 %v1469_v21, %v217_v25  ;;  %v731_v36 = vadd.f32 %v1466_v19, %v474_v1 }
  0xa8   :  { %964 = vst [vmem:[#allocation7 + $0x4b0] sm:$0xff] %v708_v29  ;;  %v219_v29 = vld [vmem:[#allocation2 + $0x588] sm:$0xff]  ;;  %v477_v34 = vmul.f32 %v1469_v21, %v218_v2  ;;  %v732_v39 = vadd.f32 %v1466_v19, %v475_v28 }
  0xa9   :  { %965 = vst [vmem:[#allocation7 + $0x4b8] sm:$0xff] %v709_v32  ;;  %v220_v32 = vld [vmem:[#allocation2 + $0x590] sm:$0xff]  ;;  %v478_v37 = vmul.f32 %v1469_v21, %v219_v29  ;;  %v733_v42 = vadd.f32 %v1466_v19, %v476_v31 }
  0xaa   :  { %966 = vst [vmem:[#allocation7 + $0x4c0] sm:$0xff] %v710_v35  ;;  %v221_v35 = vld [vmem:[#allocation2 + $0x598] sm:$0xff]  ;;  %v479_v40 = vmul.f32 %v1469_v21, %v220_v32  ;;  %v734_v45 = vadd.f32 %v1466_v19, %v477_v34 }
  0xab   :  { %967 = vst [vmem:[#allocation7 + $0x4c8] sm:$0xff] %v711_v38  ;;  %v222_v38 = vld [vmem:[#allocation2 + $0x5a0] sm:$0xff]  ;;  %v480_v43 = vmul.f32 %v1469_v21, %v221_v35  ;;  %v735_v48 = vadd.f32 %v1466_v19, %v478_v37 }
  0xac   :  { %968 = vst [vmem:[#allocation7 + $0x4d0] sm:$0xff] %v712_v41  ;;  %v223_v41 = vld [vmem:[#allocation2 + $0x5a8] sm:$0xff]  ;;  %v481_v46 = vmul.f32 %v1469_v21, %v222_v38  ;;  %v736_v51 = vadd.f32 %v1466_v19, %v479_v40 }
  0xad   :  { %969 = vst [vmem:[#allocation7 + $0x4d8] sm:$0xff] %v713_v44  ;;  %v224_v44 = vld [vmem:[#allocation2 + $0x5b0] sm:$0xff]  ;;  %v482_v49 = vmul.f32 %v1469_v21, %v223_v41  ;;  %v737_v54 = vadd.f32 %v1466_v19, %v480_v43 }
  0xae   :  { %970 = vst [vmem:[#allocation7 + $0x4e0] sm:$0xff] %v714_v47  ;;  %v225_v47 = vld [vmem:[#allocation2 + $0x5b8] sm:$0xff]  ;;  %v483_v52 = vmul.f32 %v1469_v21, %v224_v44  ;;  %v738_v57 = vadd.f32 %v1466_v19, %v481_v46 }
  0xaf   :  { %971 = vst [vmem:[#allocation7 + $0x4e8] sm:$0xff] %v715_v50  ;;  %v226_v50 = vld [vmem:[#allocation2 + $0x5c0] sm:$0xff]  ;;  %v484_v55 = vmul.f32 %v1469_v21, %v225_v47  ;;  %v739_v60 = vadd.f32 %v1466_v19, %v482_v49 }
  0xb0   :  { %972 = vst [vmem:[#allocation7 + $0x4f0] sm:$0xff] %v716_v53  ;;  %v227_v53 = vld [vmem:[#allocation2 + $0x5c8] sm:$0xff]  ;;  %v485_v58 = vmul.f32 %v1469_v21, %v226_v50  ;;  %v740_v63 = vadd.f32 %v1466_v19, %v483_v52 }
  0xb1   :  { %973 = vst [vmem:[#allocation7 + $0x4f8] sm:$0xff] %v717_v56  ;;  %v228_v56 = vld [vmem:[#allocation2 + $0x5d0] sm:$0xff]  ;;  %v486_v61 = vmul.f32 %v1469_v21, %v227_v53  ;;  %v741_v4 = vadd.f32 %v1466_v19, %v484_v55 }
  0xb2   :  { %974 = vst [vmem:[#allocation7 + $0x500] sm:$0xff] %v718_v59  ;;  %v229_v59 = vld [vmem:[#allocation2 + $0x5d8] sm:$0xff]  ;;  %v487_v0 = vmul.f32 %v1469_v21, %v228_v56  ;;  %v742_v7 = vadd.f32 %v1466_v19, %v485_v58 }
  0xb3   :  { %975 = vst [vmem:[#allocation7 + $0x508] sm:$0xff] %v719_v62  ;;  %v230_v62 = vld [vmem:[#allocation2 + $0x5e0] sm:$0xff]  ;;  %v488_v5 = vmul.f32 %v1469_v21, %v229_v59  ;;  %v743_v10 = vadd.f32 %v1466_v19, %v486_v61 }
  0xb4   :  { %976 = vst [vmem:[#allocation7 + $0x510] sm:$0xff] %v720_v3  ;;  %v231_v3 = vld [vmem:[#allocation2 + $0x5e8] sm:$0xff]  ;;  %v489_v8 = vmul.f32 %v1469_v21, %v230_v62  ;;  %v744_v13 = vadd.f32 %v1466_v19, %v487_v0 }
  0xb5   :  { %977 = vst [vmem:[#allocation7 + $0x518] sm:$0xff] %v721_v6  ;;  %v232_v6 = vld [vmem:[#allocation2 + $0x5f0] sm:$0xff]  ;;  %v490_v11 = vmul.f32 %v1469_v21, %v231_v3  ;;  %v745_v16 = vadd.f32 %v1466_v19, %v488_v5 }
  0xb6   :  { %978 = vst [vmem:[#allocation7 + $0x520] sm:$0xff] %v722_v9  ;;  %v233_v9 = vld [vmem:[#allocation2 + $0x5f8] sm:$0xff]  ;;  %v491_v14 = vmul.f32 %v1469_v21, %v232_v6  ;;  %v746_v20 = vadd.f32 %v1466_v19, %v489_v8 }
  0xb7   :  { %979 = vst [vmem:[#allocation7 + $0x528] sm:$0xff] %v723_v12  ;;  %v234_v12 = vld [vmem:[#allocation2 + $0x600] sm:$0xff]  ;;  %v492_v17 = vmul.f32 %v1469_v21, %v233_v9  ;;  %v747_v24 = vadd.f32 %v1466_v19, %v490_v11 }
  0xb8   :  { %980 = vst [vmem:[#allocation7 + $0x530] sm:$0xff] %v724_v15  ;;  %v235_v15 = vld [vmem:[#allocation2 + $0x608] sm:$0xff]  ;;  %v493_v22 = vmul.f32 %v1469_v21, %v234_v12  ;;  %v748_v1 = vadd.f32 %v1466_v19, %v491_v14 }
  0xb9   :  { %981 = vst [vmem:[#allocation7 + $0x538] sm:$0xff] %v725_v18  ;;  %v236_v18 = vld [vmem:[#allocation2 + $0x610] sm:$0xff]  ;;  %v494_v25 = vmul.f32 %v1469_v21, %v235_v15  ;;  %v749_v28 = vadd.f32 %v1466_v19, %v492_v17 }
  0xba   :  { %982 = vst [vmem:[#allocation7 + $0x540] sm:$0xff] %v726_v23  ;;  %v237_v23 = vld [vmem:[#allocation2 + $0x618] sm:$0xff]  ;;  %v495_v2 = vmul.f32 %v1469_v21, %v236_v18  ;;  %v750_v31 = vadd.f32 %v1466_v19, %v493_v22 }
  0xbb   :  { %983 = vst [vmem:[#allocation7 + $0x548] sm:$0xff] %v727_v26  ;;  %v238_v26 = vld [vmem:[#allocation2 + $0x620] sm:$0xff]  ;;  %v496_v29 = vmul.f32 %v1469_v21, %v237_v23  ;;  %v751_v34 = vadd.f32 %v1466_v19, %v494_v25 }
  0xbc   :  { %984 = vst [vmem:[#allocation7 + $0x550] sm:$0xff] %v728_v27  ;;  %v239_v27 = vld [vmem:[#allocation2 + $0x628] sm:$0xff]  ;;  %v497_v32 = vmul.f32 %v1469_v21, %v238_v26  ;;  %v752_v37 = vadd.f32 %v1466_v19, %v495_v2 }
  0xbd   :  { %985 = vst [vmem:[#allocation7 + $0x558] sm:$0xff] %v729_v30  ;;  %v240_v30 = vld [vmem:[#allocation2 + $0x630] sm:$0xff]  ;;  %v498_v35 = vmul.f32 %v1469_v21, %v239_v27  ;;  %v753_v40 = vadd.f32 %v1466_v19, %v496_v29 }
  0xbe   :  { %986 = vst [vmem:[#allocation7 + $0x560] sm:$0xff] %v730_v33  ;;  %v241_v33 = vld [vmem:[#allocation2 + $0x638] sm:$0xff]  ;;  %v499_v38 = vmul.f32 %v1469_v21, %v240_v30  ;;  %v754_v43 = vadd.f32 %v1466_v19, %v497_v32 }
  0xbf   :  { %987 = vst [vmem:[#allocation7 + $0x568] sm:$0xff] %v731_v36  ;;  %v242_v36 = vld [vmem:[#allocation2 + $0x640] sm:$0xff]  ;;  %v500_v41 = vmul.f32 %v1469_v21, %v241_v33  ;;  %v755_v46 = vadd.f32 %v1466_v19, %v498_v35 }
  0xc0   :  { %988 = vst [vmem:[#allocation7 + $0x570] sm:$0xff] %v732_v39  ;;  %v243_v39 = vld [vmem:[#allocation2 + $0x648] sm:$0xff]  ;;  %v501_v44 = vmul.f32 %v1469_v21, %v242_v36  ;;  %v756_v49 = vadd.f32 %v1466_v19, %v499_v38 }
  0xc1   :  { %989 = vst [vmem:[#allocation7 + $0x578] sm:$0xff] %v733_v42  ;;  %v244_v42 = vld [vmem:[#allocation2 + $0x650] sm:$0xff]  ;;  %v502_v47 = vmul.f32 %v1469_v21, %v243_v39  ;;  %v757_v52 = vadd.f32 %v1466_v19, %v500_v41 }
  0xc2   :  { %990 = vst [vmem:[#allocation7 + $0x580] sm:$0xff] %v734_v45  ;;  %v245_v45 = vld [vmem:[#allocation2 + $0x658] sm:$0xff]  ;;  %v503_v50 = vmul.f32 %v1469_v21, %v244_v42  ;;  %v758_v55 = vadd.f32 %v1466_v19, %v501_v44 }
  0xc3   :  { %991 = vst [vmem:[#allocation7 + $0x588] sm:$0xff] %v735_v48  ;;  %v246_v48 = vld [vmem:[#allocation2 + $0x660] sm:$0xff]  ;;  %v504_v53 = vmul.f32 %v1469_v21, %v245_v45  ;;  %v759_v58 = vadd.f32 %v1466_v19, %v502_v47 }
  0xc4   :  { %992 = vst [vmem:[#allocation7 + $0x590] sm:$0xff] %v736_v51  ;;  %v247_v51 = vld [vmem:[#allocation2 + $0x668] sm:$0xff]  ;;  %v505_v56 = vmul.f32 %v1469_v21, %v246_v48  ;;  %v760_v61 = vadd.f32 %v1466_v19, %v503_v50 }
  0xc5   :  { %993 = vst [vmem:[#allocation7 + $0x598] sm:$0xff] %v737_v54  ;;  %v248_v54 = vld [vmem:[#allocation2 + $0x670] sm:$0xff]  ;;  %v506_v59 = vmul.f32 %v1469_v21, %v247_v51  ;;  %v761_v0 = vadd.f32 %v1466_v19, %v504_v53 }
  0xc6   :  { %994 = vst [vmem:[#allocation7 + $0x5a0] sm:$0xff] %v738_v57  ;;  %v249_v57 = vld [vmem:[#allocation2 + $0x678] sm:$0xff]  ;;  %v507_v62 = vmul.f32 %v1469_v21, %v248_v54  ;;  %v762_v5 = vadd.f32 %v1466_v19, %v505_v56 }
  0xc7   :  { %995 = vst [vmem:[#allocation7 + $0x5a8] sm:$0xff] %v739_v60  ;;  %v250_v60 = vld [vmem:[#allocation2 + $0x680] sm:$0xff]  ;;  %v508_v3 = vmul.f32 %v1469_v21, %v249_v57  ;;  %v763_v8 = vadd.f32 %v1466_v19, %v506_v59 }
  0xc8   :  { %996 = vst [vmem:[#allocation7 + $0x5b0] sm:$0xff] %v740_v63  ;;  %v251_v63 = vld [vmem:[#allocation2 + $0x688] sm:$0xff]  ;;  %v509_v6 = vmul.f32 %v1469_v21, %v250_v60  ;;  %v764_v11 = vadd.f32 %v1466_v19, %v507_v62 }
  0xc9   :  { %997 = vst [vmem:[#allocation7 + $0x5b8] sm:$0xff] %v741_v4  ;;  %v252_v4 = vld [vmem:[#allocation2 + $0x690] sm:$0xff]  ;;  %v510_v9 = vmul.f32 %v1469_v21, %v251_v63  ;;  %v765_v14 = vadd.f32 %v1466_v19, %v508_v3 }
  0xca   :  { %998 = vst [vmem:[#allocation7 + $0x5c0] sm:$0xff] %v742_v7  ;;  %v253_v7 = vld [vmem:[#allocation2 + $0x698] sm:$0xff]  ;;  %v511_v12 = vmul.f32 %v1469_v21, %v252_v4  ;;  %v766_v17 = vadd.f32 %v1466_v19, %v509_v6 }
  0xcb   :  { %999 = vst [vmem:[#allocation7 + $0x5c8] sm:$0xff] %v743_v10  ;;  %v254_v10 = vld [vmem:[#allocation2 + $0x6a0] sm:$0xff]  ;;  %v512_v15 = vmul.f32 %v1469_v21, %v253_v7  ;;  %v767_v22 = vadd.f32 %v1466_v19, %v510_v9 }
  0xcc   :  { %1000 = vst [vmem:[#allocation7 + $0x5d0] sm:$0xff] %v744_v13  ;;  %v255_v13 = vld [vmem:[#allocation2 + $0x6a8] sm:$0xff]  ;;  %v513_v18 = vmul.f32 %v1469_v21, %v254_v10  ;;  %v768_v25 = vadd.f32 %v1466_v19, %v511_v12 }
  0xcd   :  { %1001 = vst [vmem:[#allocation7 + $0x5d8] sm:$0xff] %v745_v16  ;;  %v256_v16 = vld [vmem:[#allocation2 + $0x6b0] sm:$0xff]  ;;  %v514_v23 = vmul.f32 %v1469_v21, %v255_v13  ;;  %v769_v2 = vadd.f32 %v1466_v19, %v512_v15 }
  0xce   :  { %1002 = vst [vmem:[#allocation7 + $0x5e0] sm:$0xff] %v746_v20  ;;  %v257_v20 = vld [vmem:[#allocation2 + $0x6b8] sm:$0xff]  ;;  %v515_v26 = vmul.f32 %v1469_v21, %v256_v16  ;;  %v770_v29 = vadd.f32 %v1466_v19, %v513_v18 }
  0xcf   :  { %1003 = vst [vmem:[#allocation7 + $0x5e8] sm:$0xff] %v747_v24  ;;  %v258_v24 = vld [vmem:[#allocation2 + $0x6c0] sm:$0xff]  ;;  %v516_v27 = vmul.f32 %v1469_v21, %v257_v20  ;;  %v771_v32 = vadd.f32 %v1466_v19, %v514_v23 }
  0xd0   :  { %1004 = vst [vmem:[#allocation7 + $0x5f0] sm:$0xff] %v748_v1  ;;  %v259_v1 = vld [vmem:[#allocation2 + $0x6c8] sm:$0xff]  ;;  %v517_v30 = vmul.f32 %v1469_v21, %v258_v24  ;;  %v772_v35 = vadd.f32 %v1466_v19, %v515_v26 }
  0xd1   :  { %1005 = vst [vmem:[#allocation7 + $0x5f8] sm:$0xff] %v749_v28  ;;  %v260_v28 = vld [vmem:[#allocation2 + $0x6d0] sm:$0xff]  ;;  %v518_v33 = vmul.f32 %v1469_v21, %v259_v1  ;;  %v773_v38 = vadd.f32 %v1466_v19, %v516_v27 }
  0xd2   :  { %1006 = vst [vmem:[#allocation7 + $0x600] sm:$0xff] %v750_v31  ;;  %v261_v31 = vld [vmem:[#allocation2 + $0x6d8] sm:$0xff]  ;;  %v519_v36 = vmul.f32 %v1469_v21, %v260_v28  ;;  %v774_v41 = vadd.f32 %v1466_v19, %v517_v30 }
  0xd3   :  { %1007 = vst [vmem:[#allocation7 + $0x608] sm:$0xff] %v751_v34  ;;  %v262_v34 = vld [vmem:[#allocation2 + $0x6e0] sm:$0xff]  ;;  %v520_v39 = vmul.f32 %v1469_v21, %v261_v31  ;;  %v775_v44 = vadd.f32 %v1466_v19, %v518_v33 }
  0xd4   :  { %1008 = vst [vmem:[#allocation7 + $0x610] sm:$0xff] %v752_v37  ;;  %v263_v37 = vld [vmem:[#allocation2 + $0x6e8] sm:$0xff]  ;;  %v521_v42 = vmul.f32 %v1469_v21, %v262_v34  ;;  %v776_v47 = vadd.f32 %v1466_v19, %v519_v36 }
  0xd5   :  { %1009 = vst [vmem:[#allocation7 + $0x618] sm:$0xff] %v753_v40  ;;  %v264_v40 = vld [vmem:[#allocation2 + $0x6f0] sm:$0xff]  ;;  %v522_v45 = vmul.f32 %v1469_v21, %v263_v37  ;;  %v777_v50 = vadd.f32 %v1466_v19, %v520_v39 }
  0xd6   :  { %1010 = vst [vmem:[#allocation7 + $0x620] sm:$0xff] %v754_v43  ;;  %v265_v43 = vld [vmem:[#allocation2 + $0x6f8] sm:$0xff]  ;;  %v523_v48 = vmul.f32 %v1469_v21, %v264_v40  ;;  %v778_v53 = vadd.f32 %v1466_v19, %v521_v42 }
  0xd7   :  { %1011 = vst [vmem:[#allocation7 + $0x628] sm:$0xff] %v755_v46  ;;  %v266_v46 = vld [vmem:[#allocation2 + $0x700] sm:$0xff]  ;;  %v524_v51 = vmul.f32 %v1469_v21, %v265_v43  ;;  %v779_v56 = vadd.f32 %v1466_v19, %v522_v45 }
  0xd8   :  { %1012 = vst [vmem:[#allocation7 + $0x630] sm:$0xff] %v756_v49  ;;  %v267_v49 = vld [vmem:[#allocation2 + $0x708] sm:$0xff]  ;;  %v525_v54 = vmul.f32 %v1469_v21, %v266_v46  ;;  %v780_v59 = vadd.f32 %v1466_v19, %v523_v48 }
  0xd9   :  { %1013 = vst [vmem:[#allocation7 + $0x638] sm:$0xff] %v757_v52  ;;  %v268_v52 = vld [vmem:[#allocation2 + $0x710] sm:$0xff]  ;;  %v526_v57 = vmul.f32 %v1469_v21, %v267_v49  ;;  %v781_v62 = vadd.f32 %v1466_v19, %v524_v51 }
  0xda   :  { %1014 = vst [vmem:[#allocation7 + $0x640] sm:$0xff] %v758_v55  ;;  %v269_v55 = vld [vmem:[#allocation2 + $0x718] sm:$0xff]  ;;  %v527_v60 = vmul.f32 %v1469_v21, %v268_v52  ;;  %v782_v3 = vadd.f32 %v1466_v19, %v525_v54 }
  0xdb   :  { %1015 = vst [vmem:[#allocation7 + $0x648] sm:$0xff] %v759_v58  ;;  %v270_v58 = vld [vmem:[#allocation2 + $0x720] sm:$0xff]  ;;  %v528_v63 = vmul.f32 %v1469_v21, %v269_v55  ;;  %v783_v6 = vadd.f32 %v1466_v19, %v526_v57 }
  0xdc   :  { %1016 = vst [vmem:[#allocation7 + $0x650] sm:$0xff] %v760_v61  ;;  %v271_v61 = vld [vmem:[#allocation2 + $0x728] sm:$0xff]  ;;  %v529_v4 = vmul.f32 %v1469_v21, %v270_v58  ;;  %v784_v9 = vadd.f32 %v1466_v19, %v527_v60 }
  0xdd   :  { %1017 = vst [vmem:[#allocation7 + $0x658] sm:$0xff] %v761_v0  ;;  %v272_v0 = vld [vmem:[#allocation2 + $0x730] sm:$0xff]  ;;  %v530_v7 = vmul.f32 %v1469_v21, %v271_v61  ;;  %v785_v12 = vadd.f32 %v1466_v19, %v528_v63 }
  0xde   :  { %1018 = vst [vmem:[#allocation7 + $0x660] sm:$0xff] %v762_v5  ;;  %v273_v5 = vld [vmem:[#allocation2 + $0x738] sm:$0xff]  ;;  %v531_v10 = vmul.f32 %v1469_v21, %v272_v0  ;;  %v786_v15 = vadd.f32 %v1466_v19, %v529_v4 }
  0xdf   :  { %1019 = vst [vmem:[#allocation7 + $0x668] sm:$0xff] %v763_v8  ;;  %v274_v8 = vld [vmem:[#allocation2 + $0x740] sm:$0xff]  ;;  %v532_v13 = vmul.f32 %v1469_v21, %v273_v5  ;;  %v787_v18 = vadd.f32 %v1466_v19, %v530_v7 }
  0xe0   :  { %1020 = vst [vmem:[#allocation7 + $0x670] sm:$0xff] %v764_v11  ;;  %v275_v11 = vld [vmem:[#allocation2 + $0x748] sm:$0xff]  ;;  %v533_v16 = vmul.f32 %v1469_v21, %v274_v8  ;;  %v788_v23 = vadd.f32 %v1466_v19, %v531_v10 }
  0xe1   :  { %1021 = vst [vmem:[#allocation7 + $0x678] sm:$0xff] %v765_v14  ;;  %v276_v14 = vld [vmem:[#allocation2 + $0x750] sm:$0xff]  ;;  %v534_v20 = vmul.f32 %v1469_v21, %v275_v11  ;;  %v789_v26 = vadd.f32 %v1466_v19, %v532_v13 }
  0xe2   :  { %1022 = vst [vmem:[#allocation7 + $0x680] sm:$0xff] %v766_v17  ;;  %v277_v17 = vld [vmem:[#allocation2 + $0x758] sm:$0xff]  ;;  %v535_v24 = vmul.f32 %v1469_v21, %v276_v14  ;;  %v790_v27 = vadd.f32 %v1466_v19, %v533_v16 }
  0xe3   :  { %1023 = vst [vmem:[#allocation7 + $0x688] sm:$0xff] %v767_v22  ;;  %v278_v22 = vld [vmem:[#allocation2 + $0x760] sm:$0xff]  ;;  %v536_v1 = vmul.f32 %v1469_v21, %v277_v17  ;;  %v791_v30 = vadd.f32 %v1466_v19, %v534_v20 }
  0xe4   :  { %1024 = vst [vmem:[#allocation7 + $0x690] sm:$0xff] %v768_v25  ;;  %v279_v25 = vld [vmem:[#allocation2 + $0x768] sm:$0xff]  ;;  %v537_v28 = vmul.f32 %v1469_v21, %v278_v22  ;;  %v792_v33 = vadd.f32 %v1466_v19, %v535_v24 }
  0xe5   :  { %1025 = vst [vmem:[#allocation7 + $0x698] sm:$0xff] %v769_v2  ;;  %v280_v2 = vld [vmem:[#allocation2 + $0x770] sm:$0xff]  ;;  %v538_v31 = vmul.f32 %v1469_v21, %v279_v25  ;;  %v793_v36 = vadd.f32 %v1466_v19, %v536_v1 }
  0xe6   :  { %1026 = vst [vmem:[#allocation7 + $0x6a0] sm:$0xff] %v770_v29  ;;  %v281_v29 = vld [vmem:[#allocation2 + $0x778] sm:$0xff]  ;;  %v539_v34 = vmul.f32 %v1469_v21, %v280_v2  ;;  %v794_v39 = vadd.f32 %v1466_v19, %v537_v28 }
  0xe7   :  { %1027 = vst [vmem:[#allocation7 + $0x6a8] sm:$0xff] %v771_v32  ;;  %v282_v32 = vld [vmem:[#allocation2 + $0x780] sm:$0xff]  ;;  %v540_v37 = vmul.f32 %v1469_v21, %v281_v29  ;;  %v795_v42 = vadd.f32 %v1466_v19, %v538_v31 }
  0xe8   :  { %1028 = vst [vmem:[#allocation7 + $0x6b0] sm:$0xff] %v772_v35  ;;  %v283_v35 = vld [vmem:[#allocation2 + $0x788] sm:$0xff]  ;;  %v541_v40 = vmul.f32 %v1469_v21, %v282_v32  ;;  %v796_v45 = vadd.f32 %v1466_v19, %v539_v34 }
  0xe9   :  { %1029 = vst [vmem:[#allocation7 + $0x6b8] sm:$0xff] %v773_v38  ;;  %v284_v38 = vld [vmem:[#allocation2 + $0x790] sm:$0xff]  ;;  %v542_v43 = vmul.f32 %v1469_v21, %v283_v35  ;;  %v797_v48 = vadd.f32 %v1466_v19, %v540_v37 }
  0xea   :  { %1030 = vst [vmem:[#allocation7 + $0x6c0] sm:$0xff] %v774_v41  ;;  %v285_v41 = vld [vmem:[#allocation2 + $0x798] sm:$0xff]  ;;  %v543_v46 = vmul.f32 %v1469_v21, %v284_v38  ;;  %v798_v51 = vadd.f32 %v1466_v19, %v541_v40 }
  0xeb   :  { %1031 = vst [vmem:[#allocation7 + $0x6c8] sm:$0xff] %v775_v44  ;;  %v286_v44 = vld [vmem:[#allocation2 + $0x7a0] sm:$0xff]  ;;  %v544_v49 = vmul.f32 %v1469_v21, %v285_v41  ;;  %v799_v54 = vadd.f32 %v1466_v19, %v542_v43 }
  0xec   :  { %1032 = vst [vmem:[#allocation7 + $0x6d0] sm:$0xff] %v776_v47  ;;  %v287_v47 = vld [vmem:[#allocation2 + $0x7a8] sm:$0xff]  ;;  %v545_v52 = vmul.f32 %v1469_v21, %v286_v44  ;;  %v800_v57 = vadd.f32 %v1466_v19, %v543_v46 }
  0xed   :  { %1033 = vst [vmem:[#allocation7 + $0x6d8] sm:$0xff] %v777_v50  ;;  %v288_v50 = vld [vmem:[#allocation2 + $0x7b0] sm:$0xff]  ;;  %v546_v55 = vmul.f32 %v1469_v21, %v287_v47  ;;  %v801_v60 = vadd.f32 %v1466_v19, %v544_v49 }
  0xee   :  { %1034 = vst [vmem:[#allocation7 + $0x6e0] sm:$0xff] %v778_v53  ;;  %v289_v53 = vld [vmem:[#allocation2 + $0x7b8] sm:$0xff]  ;;  %v547_v58 = vmul.f32 %v1469_v21, %v288_v50  ;;  %v802_v63 = vadd.f32 %v1466_v19, %v545_v52 }
  0xef   :  { %1035 = vst [vmem:[#allocation7 + $0x6e8] sm:$0xff] %v779_v56  ;;  %v290_v56 = vld [vmem:[#allocation2 + $0x7c0] sm:$0xff]  ;;  %v548_v61 = vmul.f32 %v1469_v21, %v289_v53  ;;  %v803_v4 = vadd.f32 %v1466_v19, %v546_v55 }
  0xf0   :  { %1036 = vst [vmem:[#allocation7 + $0x6f0] sm:$0xff] %v780_v59  ;;  %v291_v59 = vld [vmem:[#allocation2 + $0x7c8] sm:$0xff]  ;;  %v549_v0 = vmul.f32 %v1469_v21, %v290_v56  ;;  %v804_v7 = vadd.f32 %v1466_v19, %v547_v58 }
  0xf1   :  { %1037 = vst [vmem:[#allocation7 + $0x6f8] sm:$0xff] %v781_v62  ;;  %v292_v62 = vld [vmem:[#allocation2 + $0x7d0] sm:$0xff]  ;;  %v550_v5 = vmul.f32 %v1469_v21, %v291_v59  ;;  %v805_v10 = vadd.f32 %v1466_v19, %v548_v61 }
  0xf2   :  { %1038 = vst [vmem:[#allocation7 + $0x700] sm:$0xff] %v782_v3  ;;  %v293_v3 = vld [vmem:[#allocation2 + $0x7d8] sm:$0xff]  ;;  %v551_v8 = vmul.f32 %v1469_v21, %v292_v62  ;;  %v806_v13 = vadd.f32 %v1466_v19, %v549_v0 }
  0xf3   :  { %1039 = vst [vmem:[#allocation7 + $0x708] sm:$0xff] %v783_v6  ;;  %v294_v6 = vld [vmem:[#allocation2 + $0x7e0] sm:$0xff]  ;;  %v552_v11 = vmul.f32 %v1469_v21, %v293_v3  ;;  %v807_v16 = vadd.f32 %v1466_v19, %v550_v5 }
  0xf4   :  { %1040 = vst [vmem:[#allocation7 + $0x710] sm:$0xff] %v784_v9  ;;  %v295_v9 = vld [vmem:[#allocation2 + $0x7e8] sm:$0xff]  ;;  %v553_v14 = vmul.f32 %v1469_v21, %v294_v6 }
  0xf5   :  { %1041 = vst [vmem:[#allocation7 + $0x718] sm:$0xff] %v785_v12  ;;  %v296_v12 = vld [vmem:[#allocation2 + $0x7f0] sm:$0xff]  ;;  %v554_v17 = vmul.f32 %v1469_v21, %v295_v9  ;;  %v809_v22 = vadd.f32 %v1466_v19, %v552_v11 }
  0xf6   :  { %1042 = vst [vmem:[#allocation7 + $0x720] sm:$0xff] %v786_v15  ;;  %v297_v15 = vld [vmem:[#allocation2 + $0x7f8] sm:$0xff]  ;;  %v555_v20 = vmul.f32 %v1469_v21, %v296_v12  ;;  %v810_v24 = vadd.f32 %v1466_v19, %v553_v14 }
  0xf7   :  { %1043 = vst [vmem:[#allocation7 + $0x728] sm:$0xff] %v787_v18  ;;  %v808_v18 = vadd.f32 %v1466_v19, %v551_v8  ;;  %v811_v25 = vadd.f32 %v1466_v19, %v554_v17 }
  0xf8   :  { %1044 = vst [vmem:[#allocation7 + $0x730] sm:$0xff] %v788_v23  ;;  %v556_v23 = vmul.f32 %v1469_v21, %v297_v15 }
  0xf9   :  { %1045 = vst [vmem:[#allocation7 + $0x738] sm:$0xff] %v789_v26  ;;  %v812_v26 = vadd.f32 %v1466_v19, %v555_v20 }
  0xfa   :  { %1046 = vst [vmem:[#allocation7 + $0x740] sm:$0xff] %v790_v27  ;;  %v813_v1 = vadd.f32 %v1466_v19, %v556_v23 }
  0xfb   :  { %1047 = vst [vmem:[#allocation7 + $0x748] sm:$0xff] %v791_v30 }
  0xfc   :  { %1048 = vst [vmem:[#allocation7 + $0x750] sm:$0xff] %v792_v33 }
  0xfd   :  { %1049 = vst [vmem:[#allocation7 + $0x758] sm:$0xff] %v793_v36 }
  0xfe   :  { %1050 = vst [vmem:[#allocation7 + $0x760] sm:$0xff] %v794_v39 }
  0xff   :  { %1051 = vst [vmem:[#allocation7 + $0x768] sm:$0xff] %v795_v42 }
 0x100   :  { %1052 = vst [vmem:[#allocation7 + $0x770] sm:$0xff] %v796_v45 }
 0x101   :  { %1053 = vst [vmem:[#allocation7 + $0x778] sm:$0xff] %v797_v48 }
 0x102   :  { %1054 = vst [vmem:[#allocation7 + $0x780] sm:$0xff] %v798_v51 }
 0x103   :  { %1055 = vst [vmem:[#allocation7 + $0x788] sm:$0xff] %v799_v54 }
 0x104   :  { %1056 = vst [vmem:[#allocation7 + $0x790] sm:$0xff] %v800_v57 }
 0x105   :  { %1057 = vst [vmem:[#allocation7 + $0x798] sm:$0xff] %v801_v60 }
 0x106   :  { %1058 = vst [vmem:[#allocation7 + $0x7a0] sm:$0xff] %v802_v63 }
 0x107   :  { %1059 = vst [vmem:[#allocation7 + $0x7a8] sm:$0xff] %v803_v4 }
 0x108   :  { %1060 = vst [vmem:[#allocation7 + $0x7b0] sm:$0xff] %v804_v7 }
 0x109   :  { %1061 = vst [vmem:[#allocation7 + $0x7b8] sm:$0xff] %v805_v10 }
 0x10a   :  { %1062 = vst [vmem:[#allocation7 + $0x7c0] sm:$0xff] %v806_v13 }
 0x10b   :  { %1063 = vst [vmem:[#allocation7 + $0x7c8] sm:$0xff] %v807_v16 }
 0x10c   :  { %1064 = vst [vmem:[#allocation7 + $0x7d0] sm:$0xff] %v808_v18 }
 0x10d   :  { %1065 = vst [vmem:[#allocation7 + $0x7d8] sm:$0xff] %v809_v22 }
 0x10e   :  { %1066 = vst [vmem:[#allocation7 + $0x7e0] sm:$0xff] %v810_v24 }
 0x10f   :  { %1067 = vst [vmem:[#allocation7 + $0x7e8] sm:$0xff] %v811_v25 }
 0x110   :  { %1068 = vst [vmem:[#allocation7 + $0x7f0] sm:$0xff] %v812_v26 }
 0x111   :  { %1069 = vst [vmem:[#allocation7 + $0x7f8] sm:$0xff] %v813_v1 }
 0x112   :  { %1082 = dma.vmem_to_hbm [thread:$0]  %s1075_s1, 32768, %s1077_s23, [#allocation4], %s1178_s17, %s1178_s17, %s1179_s18  }
 0x113   :  { %1175 = dma.done.wait [#allocation4], 32768  }
 0x114   :  { %1176 = vsyncadd [#allocation4], 4294934528 }
 0x115   :  { %1087 = vsyncpa [#allocation3], 1 }
 0x116   :  { %1088 = vsyncpa [#allocation6], 1 }
 0x117   :  { %1089 = vsyncpa [#allocation4], 1 }

</bundles_post_ra>
